<compile_context>
chip_gen: v7x
topology: tpu7x:2x2x1
jax: 0.10.0
libtpu: 0.0.40
codegen_flags: <defaults>
</compile_context>

<pallas_src>
import jax
import jax.numpy as jnp
from jax.experimental import pallas as pl
from jax.experimental.pallas import tpu as pltpu


def _leaky_relu(x, slope=0.2):
    return jnp.where(x > 0, x, slope * x)


def _round_up(x, m):
    return ((x + m - 1) // m) * m


def discriminator_kernel(img_ref, e1_ref,
                         w1_ref, w2_ref, b2_ref, w3_ref, b3_ref,
                         w4t_ref, b4_ref, o_ref):
    # Layer 1: MXU-aligned K = prod(img_shape); embedding contribution and b1
    # are pre-folded into e1 (f32), added post-accumulation.
    h = jnp.dot(img_ref[...], w1_ref[...],
                preferred_element_type=jnp.float32) + e1_ref[...]
    h = _leaky_relu(h)

    # Layer 2. TODO(synk): Dropout(0.4) is identity in eval mode; training-mode
    # masking would need pltpu.prng_seed + pltpu.prng_random_bits.
    h = jnp.dot(h.astype(jnp.bfloat16), w2_ref[...],
                preferred_element_type=jnp.float32) + b2_ref[...]
    h = _leaky_relu(h)

    # Layer 3 (Dropout identity, same as above).
    h = jnp.dot(h.astype(jnp.bfloat16), w3_ref[...],
                preferred_element_type=jnp.float32) + b3_ref[...]
    h = _leaky_relu(h)

    # Layer 4: Linear(512, 1) as a lane-reduce on the VPU/XLU — avoids an MXU
    # pass that would use only 1 of 128/256 output columns.
    o_ref[...] = (jnp.sum(h * w4t_ref[...], axis=-1, keepdims=True)
                  + b4_ref[0, 0])


def discriminator_forward(x, labels, params, *, tile_b=256):
    """x: (B, C, H, W) float32, labels: (B,) int32 -> (B, 1) float32."""
    B = x.shape[0]
    hidden = params["w2"].shape[0]

    # Flatten image row-major, exactly like torch's x.view(B, -1).
    img_flat = x.reshape(B, -1).astype(jnp.float32)
    d_img = img_flat.shape[1]

    # Fold label embedding + b1 into a per-row additive term for layer 1.
    w1_img = params["w1"][:d_img]                         # (d_img, H)
    w1_emb = params["w1"][d_img:]                         # (num_classes, H)
    emb_rows = jnp.take(params["emb"], labels, axis=0)    # (B, num_classes)
    e1 = emb_rows @ w1_emb + params["b1"]                 # (B, H) f32

    # bf16 matmul operands, f32 accumulation / elementwise.
    img_bf = img_flat.astype(jnp.bfloat16)
    w1_bf = w1_img.astype(jnp.bfloat16)
    w2_bf = params["w2"].astype(jnp.bfloat16)
    w3_bf = params["w3"].astype(jnp.bfloat16)
    w4t = params["w4"].T.astype(jnp.float32)              # (1, H)

    # Batch tiling: pad B up to a multiple of the tile so the grid is exact.
    tile_b = min(tile_b, _round_up(B, 8))
    b_pad = _round_up(B, tile_b)
    if b_pad != B:
        pad = b_pad - B
        img_bf = jnp.pad(img_bf, ((0, pad), (0, 0)))
        e1 = jnp.pad(e1, ((0, pad), (0, 0)))

    grid = (b_pad // tile_b,)
    stream = lambda i: (i, 0)   # per-tile activation stream
    const = lambda i: (0, 0)    # VMEM-resident weights/biases (no re-DMA per step)

    out = pl.pallas_call(
        discriminator_kernel,
        out_shape=jax.ShapeDtypeStruct((b_pad, 1), jnp.float32),
        grid=grid,
        in_specs=[
            pl.BlockSpec((tile_b, d_img), stream),     # image features (bf16)
            pl.BlockSpec((tile_b, hidden), stream),    # folded emb + b1 (f32)
            pl.BlockSpec((d_img, hidden), const),      # w1 (bf16)
            pl.BlockSpec((hidden, hidden), const),     # w2 (bf16)
            pl.BlockSpec((1, hidden), const),          # b2 (f32)
            pl.BlockSpec((hidden, hidden), const),     # w3 (bf16)
            pl.BlockSpec((1, hidden), const),          # b3 (f32)
            pl.BlockSpec((1, hidden), const),          # w4^T (f32)
            pl.BlockSpec(memory_space=pltpu.MemorySpace.SMEM),  # b4 scalar
        ],
        out_specs=pl.BlockSpec((tile_b, 1), stream),
        compiler_params=pltpu.CompilerParams(
            dimension_semantics=("parallel",)),
    )(img_bf, e1, w1_bf, w2_bf, params["b2"], w3_bf, params["b3"], w4t,
      params["b4"])

    return out[:B]


def init_params(key, num_classes, img_shape, hidden=512):
    d_img = 1
    for s in img_shape:
        d_img *= int(s)
    d_in = num_classes + d_img
    ks = jax.random.split(key, 9)

    def linear(kw, kb, fan_in, fan_out):
        # PyTorch nn.Linear default init: U(-1/sqrt(fan_in), 1/sqrt(fan_in)).
        bound = 1.0 / float(fan_in) ** 0.5
        w = jax.random.uniform(kw, (fan_in, fan_out), jnp.float32, -bound, bound)
        b = jax.random.uniform(kb, (1, fan_out), jnp.float32, -bound, bound)
        return w, b

    w1, b1 = linear(ks[1], ks[2], d_in, hidden)
    w2, b2 = linear(ks[3], ks[4], hidden, hidden)
    w3, b3 = linear(ks[5], ks[6], hidden, hidden)
    w4, b4 = linear(ks[7], ks[8], hidden, 1)
    return {
        "emb": jax.random.normal(ks[0], (num_classes, num_classes), jnp.float32),
        "w1": w1, "b1": b1,
        "w2": w2, "b2": b2,
        "w3": w3, "b3": b3,
        "w4": w4, "b4": b4,
    }


def reference_forward(x, labels, params):
    """Pure-JAX reference using the same bf16 operand rounding as the kernel,
    so the comparison isolates accumulation-order differences only."""
    B = x.shape[0]
    img = x.reshape(B, -1).astype(jnp.float32)
    d_img = img.shape[1]
    w1_img = params["w1"][:d_img]
    w1_emb = params["w1"][d_img:]
    e1 = jnp.take(params["emb"], labels, axis=0) @ w1_emb + params["b1"]

    def bf(a):
        return a.astype(jnp.bfloat16).astype(jnp.float32)

    h = bf(img) @ bf(w1_img) + e1
    h = jnp.where(h > 0, h, 0.2 * h)
    h = bf(h) @ bf(params["w2"]) + params["b2"]
    h = jnp.where(h > 0, h, 0.2 * h)
    h = bf(h) @ bf(params["w3"]) + params["b3"]
    h = jnp.where(h > 0, h, 0.2 * h)
    return h @ params["w4"] + params["b4"]


if __name__ == "__main__":
    num_classes = 10
    img_shape = (4, 16, 16)        # (C, H, W) -> 1024 flattened features
    B = 2

    key = jax.random.PRNGKey(0)
    k_params, k_x, k_lab = jax.random.split(key, 3)

    params = init_params(k_params, num_classes, img_shape)
    x = jax.random.normal(k_x, (B,) + img_shape, jnp.float32)
    labels = jax.random.randint(k_lab, (B,), 0, num_classes, jnp.int32)

    out = jax.block_until_ready(discriminator_forward(x, labels, params))
    ref = reference_forward(x, labels, params)

    assert out.shape == (B, 1)
    assert jnp.allclose(out, ref, atol=2e-3, rtol=2e-3), (
        float(jnp.max(jnp.abs(out - ref))))
    print("KERNEL_OK")
</pallas_src>

<mosaic_0001>
module attributes {stable_mosaic.version = 11 : i64} {
  func.func @discriminator_kernel(%arg0: i32, %arg1: memref<8x1024xbf16, #tpu.memory_space<vmem>>, %arg2: memref<8x512xf32, #tpu.memory_space<vmem>>, %arg3: memref<1024x512xbf16, #tpu.memory_space<vmem>>, %arg4: memref<512x512xbf16, #tpu.memory_space<vmem>>, %arg5: memref<1x512xf32, #tpu.memory_space<vmem>>, %arg6: memref<512x512xbf16, #tpu.memory_space<vmem>>, %arg7: memref<1x512xf32, #tpu.memory_space<vmem>>, %arg8: memref<1x512xf32, #tpu.memory_space<vmem>>, %arg9: memref<1x1xf32, #tpu.memory_space<smem>>, %arg10: memref<8x1xf32, #tpu.memory_space<vmem>>) attributes {dimension_semantics = [#tpu.dimension_semantics<parallel>], iteration_bounds = array<i64: 1>, scalar_prefetch = 0 : i64, scratch_operands = 0 : i64, tpu.core_type = #tpu.core_type<tc>, window_params = [{transform_indices = @transform_0, window_bounds = array<i64: 8, 1024>}, {transform_indices = @transform_1, window_bounds = array<i64: 8, 512>}, {pipeline_mode = #tpu.pipeline_mode<synchronous>, transform_indices = @transform_2, window_bounds = array<i64: 1024, 512>}, {pipeline_mode = #tpu.pipeline_mode<synchronous>, transform_indices = @transform_3, window_bounds = array<i64: 512, 512>}, {pipeline_mode = #tpu.pipeline_mode<synchronous>, transform_indices = @transform_4, window_bounds = array<i64: 1, 512>}, {pipeline_mode = #tpu.pipeline_mode<synchronous>, transform_indices = @transform_5, window_bounds = array<i64: 512, 512>}, {pipeline_mode = #tpu.pipeline_mode<synchronous>, transform_indices = @transform_6, window_bounds = array<i64: 1, 512>}, {pipeline_mode = #tpu.pipeline_mode<synchronous>, transform_indices = @transform_7, window_bounds = array<i64: 1, 512>}, {transform_indices = @transform_8, window_bounds = array<i64: 1, 1>}, {transform_indices = @transform_9, window_bounds = array<i64: 8, 1>}]} {
    %c0 = arith.constant 0 : index
    %c0_0 = arith.constant 0 : index
    %0 = vector.load %arg1[%c0, %c0_0] : memref<8x1024xbf16, #tpu.memory_space<vmem>>, vector<8x1024xbf16>
    %c0_1 = arith.constant 0 : index
    %c0_2 = arith.constant 0 : index
    %1 = vector.load %arg3[%c0_1, %c0_2] : memref<1024x512xbf16, #tpu.memory_space<vmem>>, vector<1024x512xbf16>
    %cst = arith.constant dense<0.000000e+00> : vector<8x512xf32>
    %2 = tpu.matmul %0, %1, %cst {dimension_numbers = #tpu.dot_dimension_numbers<[1], [0], [0], [1], [0, 0, 1, 1], [], []>} : vector<8x1024xbf16>, vector<1024x512xbf16>, vector<8x512xf32> -> vector<8x512xf32>
    %c0_3 = arith.constant 0 : index
    %c0_4 = arith.constant 0 : index
    %3 = vector.load %arg2[%c0_3, %c0_4] : memref<8x512xf32, #tpu.memory_space<vmem>>, vector<8x512xf32>
    %4 = arith.addf %2, %3 : vector<8x512xf32>
    %cst_5 = arith.constant 0.000000e+00 : f32
    %5 = vector.broadcast %cst_5 : f32 to vector<8x512xf32>
    %6 = arith.cmpf ogt, %4, %5 : vector<8x512xf32>
    %cst_6 = arith.constant 2.000000e-01 : f32
    %7 = vector.broadcast %cst_6 : f32 to vector<8x512xf32>
    %8 = arith.mulf %7, %4 : vector<8x512xf32>
    %9 = arith.select %6, %4, %8 : vector<8x512xi1>, vector<8x512xf32>
    %10 = arith.truncf %9 : vector<8x512xf32> to vector<8x512xbf16>
    %c0_7 = arith.constant 0 : index
    %c0_8 = arith.constant 0 : index
    %11 = vector.load %arg4[%c0_7, %c0_8] : memref<512x512xbf16, #tpu.memory_space<vmem>>, vector<512x512xbf16>
    %cst_9 = arith.constant dense<0.000000e+00> : vector<8x512xf32>
    %12 = tpu.matmul %10, %11, %cst_9 {dimension_numbers = #tpu.dot_dimension_numbers<[1], [0], [0], [1], [0, 0, 1, 1], [], []>} : vector<8x512xbf16>, vector<512x512xbf16>, vector<8x512xf32> -> vector<8x512xf32>
    %c0_10 = arith.constant 0 : index
    %c0_11 = arith.constant 0 : index
    %13 = vector.load %arg5[%c0_10, %c0_11] : memref<1x512xf32, #tpu.memory_space<vmem>>, vector<1x512xf32>
    %14 = vector.broadcast %13 : vector<1x512xf32> to vector<8x512xf32>
    %15 = arith.addf %12, %14 : vector<8x512xf32>
    %cst_12 = arith.constant 0.000000e+00 : f32
    %16 = vector.broadcast %cst_12 : f32 to vector<8x512xf32>
    %17 = arith.cmpf ogt, %15, %16 : vector<8x512xf32>
    %cst_13 = arith.constant 2.000000e-01 : f32
    %18 = vector.broadcast %cst_13 : f32 to vector<8x512xf32>
    %19 = arith.mulf %18, %15 : vector<8x512xf32>
    %20 = arith.select %17, %15, %19 : vector<8x512xi1>, vector<8x512xf32>
    %21 = arith.truncf %20 : vector<8x512xf32> to vector<8x512xbf16>
    %c0_14 = arith.constant 0 : index
    %c0_15 = arith.constant 0 : index
    %22 = vector.load %arg6[%c0_14, %c0_15] : memref<512x512xbf16, #tpu.memory_space<vmem>>, vector<512x512xbf16>
    %cst_16 = arith.constant dense<0.000000e+00> : vector<8x512xf32>
    %23 = tpu.matmul %21, %22, %cst_16 {dimension_numbers = #tpu.dot_dimension_numbers<[1], [0], [0], [1], [0, 0, 1, 1], [], []>} : vector<8x512xbf16>, vector<512x512xbf16>, vector<8x512xf32> -> vector<8x512xf32>
    %c0_17 = arith.constant 0 : index
    %c0_18 = arith.constant 0 : index
    %24 = vector.load %arg7[%c0_17, %c0_18] : memref<1x512xf32, #tpu.memory_space<vmem>>, vector<1x512xf32>
    %25 = vector.broadcast %24 : vector<1x512xf32> to vector<8x512xf32>
    %26 = arith.addf %23, %25 : vector<8x512xf32>
    %cst_19 = arith.constant 0.000000e+00 : f32
    %27 = vector.broadcast %cst_19 : f32 to vector<8x512xf32>
    %28 = arith.cmpf ogt, %26, %27 : vector<8x512xf32>
    %cst_20 = arith.constant 2.000000e-01 : f32
    %29 = vector.broadcast %cst_20 : f32 to vector<8x512xf32>
    %30 = arith.mulf %29, %26 : vector<8x512xf32>
    %31 = arith.select %28, %26, %30 : vector<8x512xi1>, vector<8x512xf32>
    %c0_21 = arith.constant 0 : index
    %c0_22 = arith.constant 0 : index
    %32 = vector.load %arg8[%c0_21, %c0_22] : memref<1x512xf32, #tpu.memory_space<vmem>>, vector<1x512xf32>
    %33 = vector.broadcast %32 : vector<1x512xf32> to vector<8x512xf32>
    %34 = arith.mulf %31, %33 : vector<8x512xf32>
    %cst_23 = arith.constant dense<0.000000e+00> : vector<8xf32>
    %35 = vector.multi_reduction <add>, %34, %cst_23 [1] : vector<8x512xf32> to vector<8xf32>
    %36 = vector.shape_cast %35 : vector<8xf32> to vector<8x1xf32>
    %c0_24 = arith.constant 0 : index
    %c0_25 = arith.constant 0 : index
    %37 = memref.load %arg9[%c0_24, %c0_25] : memref<1x1xf32, #tpu.memory_space<smem>>
    %38 = vector.broadcast %37 : f32 to vector<8x1xf32>
    %39 = arith.addf %36, %38 : vector<8x1xf32>
    %c0_26 = arith.constant 0 : index
    %c0_27 = arith.constant 0 : index
    %40 = vector.load %arg10[%c0_26, %c0_27] : memref<8x1xf32, #tpu.memory_space<vmem>>, vector<8x1xf32>
    tpu.vector_store %arg10[%c0_26, %c0_27], %39 {strides = array<i32>} : memref<8x1xf32, #tpu.memory_space<vmem>>, vector<8x1xf32>,
    return
  }
  func.func @transform_0(%arg0: i32) -> (i32, i32) {
    %c0_i32 = arith.constant 0 : i32
    %c0_i32_0 = arith.constant 0 : i32
    return %arg0, %c0_i32 : i32, i32
  }
  func.func @transform_1(%arg0: i32) -> (i32, i32) {
    %c0_i32 = arith.constant 0 : i32
    %c0_i32_0 = arith.constant 0 : i32
    return %arg0, %c0_i32 : i32, i32
  }
  func.func @transform_2(%arg0: i32) -> (i32, i32) {
    %c0_i32 = arith.constant 0 : i32
    %c0_i32_0 = arith.constant 0 : i32
    %c0_i32_1 = arith.constant 0 : i32
    return %c0_i32, %c0_i32_0 : i32, i32
  }
  func.func @transform_3(%arg0: i32) -> (i32, i32) {
    %c0_i32 = arith.constant 0 : i32
    %c0_i32_0 = arith.constant 0 : i32
    %c0_i32_1 = arith.constant 0 : i32
    return %c0_i32, %c0_i32_0 : i32, i32
  }
  func.func @transform_4(%arg0: i32) -> (i32, i32) {
    %c0_i32 = arith.constant 0 : i32
    %c0_i32_0 = arith.constant 0 : i32
    %c0_i32_1 = arith.constant 0 : i32
    return %c0_i32, %c0_i32_0 : i32, i32
  }
  func.func @transform_5(%arg0: i32) -> (i32, i32) {
    %c0_i32 = arith.constant 0 : i32
    %c0_i32_0 = arith.constant 0 : i32
    %c0_i32_1 = arith.constant 0 : i32
    return %c0_i32, %c0_i32_0 : i32, i32
  }
  func.func @transform_6(%arg0: i32) -> (i32, i32) {
    %c0_i32 = arith.constant 0 : i32
    %c0_i32_0 = arith.constant 0 : i32
    %c0_i32_1 = arith.constant 0 : i32
    return %c0_i32, %c0_i32_0 : i32, i32
  }
  func.func @transform_7(%arg0: i32) -> (i32, i32) {
    %c0_i32 = arith.constant 0 : i32
    %c0_i32_0 = arith.constant 0 : i32
    %c0_i32_1 = arith.constant 0 : i32
    return %c0_i32, %c0_i32_0 : i32, i32
  }
  func.func @transform_8(%arg0: i32) -> (i32, i32) {
    %c0_i32 = arith.constant 0 : i32
    %c0_i32_0 = arith.constant 0 : i32
    %c0_i32_1 = arith.constant 0 : i32
    return %c0_i32, %c0_i32_0 : i32, i32
  }
  func.func @transform_9(%arg0: i32) -> (i32, i32) {
    %c0_i32 = arith.constant 0 : i32
    %c0_i32_0 = arith.constant 0 : i32
    return %arg0, %c0_i32 : i32, i32
  }
}

</mosaic_0001>

<bundles_post_ra>
// kernel: tpu_custom_call.1
= control target key start
LH: loop header
LB: loop body
LE: loop exit
PB: predicated region body
PF: predicated region fallthrough
CT: control target
= control target key end

     0   :  { %15 = vsyncpa [#allocation4], 0  ;;  %s5660_s0 = inlined_call_operand.hbm [shape: bf16[8,1024], index: 0, kind: input, shape index: {}]   ;;  %s5661_s1 = inlined_call_operand.hbm [shape: f32[8,512], index: 1, kind: input, shape index: {}]   ;;  %s5662_s2 = inlined_call_operand.hbm [shape: bf16[1024,512], index: 2, kind: input, shape index: {}]   ;;  %s5663_s3 = inlined_call_operand.hbm [shape: bf16[512,512], index: 3, kind: input, shape index: {}]   ;;  %s5664_s4 = inlined_call_operand.vmem [shape: f32[1,512], index: 4, kind: input, shape index: {}]   ;;  %s5665_s5 = inlined_call_operand.hbm [shape: bf16[512,512], index: 5, kind: input, shape index: {}]   ;;  %s5666_s6 = inlined_call_operand.vmem [shape: f32[1,512], index: 6, kind: input, shape index: {}]   ;;  %s5667_s7 = inlined_call_operand.vmem [shape: f32[1,512], index: 7, kind: input, shape index: {}]   ;;  %s5668_s8 = inlined_call_operand.<no memory space> [shape: f32[1,1], index: 8, kind: input, shape index: {}]   ;;  %s5669_s9 = inlined_call_operand.vmem [shape: f32[8,1], index: 9, kind: output, shape index: {}]  }
   0x1   :  { %16 = vsyncpa [#allocation6], 0 }
   0x2   :  { %17 = vsyncpa [#allocation9], 0  ;;  %s5463_s30 = smov [#allocation5]   ;;  %s5347_s13 = scalar_lea.hbm %s5661_s1, 512 }
   0x3   :  { %s34_s10 = sshll.u32 %s5463_s30, 4  ;;  %p5348_p0 = scmp.ne.s32.totalorder %s5661_s1, %s5347_s13  ;;  %s35_s10 = int_to_ptr.vmem [resolvable:$true] %s34_s10 }
   0x4   :  { %p5351_p1 = scmp.lt.u32.totalorder %s5347_s13, %s5661_s1 }
   0x6   :  { %p5353_p2 = pnand %p5351_p1, %p5348_p0 }
   0x8   :  { %5356 = shalt.err (!%p5353_p2)
}
   0x9   :  { %s5357_s18 = scalar_lea.vmem %s35_s10, 512  ;;  %p5362_p4 = scmp.lt.s32.totalorder %s35_s10, %s35_s10 }
   0xa   :  { %p5358_p3 = scmp.ne.s32.totalorder %s35_s10, %s5357_s18  ;;  %p5363_p5 = scmp.lt.s32.totalorder %s5357_s18, %s5357_s18 }
   0xc   :  { %p5364_p6 = por %p5363_p5, %p5362_p4 }
   0xe   :  { %p5365_p7 = pnand %p5364_p6, %p5358_p3 }
  0x10   :  { %5368 = shalt.err (!%p5365_p7)
}
  0x11   :  { %37 = dma.hbm_to_vmem [thread:$0]  %s5661_s1, 512, %s35_s10, [#allocation6]  }
  0x12   :  { %s5464_s21 = smov [#allocation8]   ;;  %s5465_s23 = smov [#allocation3]  }
  0x13   :  { %s55_s22 = sshll.u32 %s5464_s21, 4  ;;  %s24_s24 = sshll.u32 %s5465_s23, 4  ;;  %s56_s22 = int_to_ptr.vmem [resolvable:$true] %s55_s22  ;;  %s25_s24 = int_to_ptr.vmem [resolvable:$true] %s24_s24 }
  0x14   :  { %s5369_s27 = scalar_lea.hbm %s5663_s3, 16384 }
  0x15   :  { %p5370_p8 = scmp.ne.s32.totalorder %s5663_s3, %s5369_s27  ;;  %p5373_p9 = scmp.lt.u32.totalorder %s5369_s27, %s5663_s3 }
  0x17   :  { %p5375_p10 = pnand %p5373_p9, %p5370_p8 }
  0x19   :  { %5378 = shalt.err (!%p5375_p10)
}
  0x1a   :  { %s5379_s1 = scalar_lea.vmem %s56_s22, 16384  ;;  %p5384_p12 = scmp.lt.s32.totalorder %s56_s22, %s56_s22 }
  0x1b   :  { %p5380_p11 = scmp.ne.s32.totalorder %s56_s22, %s5379_s1  ;;  %p5385_p13 = scmp.lt.s32.totalorder %s5379_s1, %s5379_s1 }
  0x1d   :  { %p5386_p0 = por %p5385_p13, %p5384_p12 }
  0x1f   :  { %p5387_p1 = pnand %p5386_p0, %p5380_p11 }
  0x21   :  { %5390 = shalt.err (!%p5387_p1)
}
  0x22   :  { %s5466_s10 = smov 256   ;;  %s5467_s12 = smov 16  }
  0x23   :  { %61 = dma.hbm_to_vmem [thread:$0]  %s5663_s3, 16384, %s56_s22, [#allocation9], %s5466_s10, %s5466_s10, %s5467_s12  }
  0x24   :  { %s5391_s17 = scalar_lea.hbm %s5660_s0, 512 }
  0x25   :  { %p5392_p2 = scmp.ne.s32.totalorder %s5660_s0, %s5391_s17  ;;  %p5395_p3 = scmp.lt.u32.totalorder %s5391_s17, %s5660_s0 }
  0x27   :  { %p5397_p4 = pnand %p5395_p3, %p5392_p2 }
  0x29   :  { %5400 = shalt.err (!%p5397_p4)
}
  0x2a   :  { %s5401_s23 = scalar_lea.vmem %s25_s24, 512  ;;  %p5406_p6 = scmp.lt.s32.totalorder %s25_s24, %s25_s24 }
  0x2b   :  { %p5402_p5 = scmp.ne.s32.totalorder %s25_s24, %s5401_s23  ;;  %p5407_p7 = scmp.lt.s32.totalorder %s5401_s23, %s5401_s23 }
  0x2d   :  { %p5408_p8 = por %p5407_p7, %p5406_p6 }
  0x2f   :  { %p5409_p9 = pnand %p5408_p8, %p5402_p5 }
  0x31   :  { %5412 = shalt.err (!%p5409_p9)
}
  0x32   :  { %27 = dma.hbm_to_vmem [thread:$0]  %s5660_s0, 512, %s25_s24, [#allocation4]  }
  0x33   :  { %s5468_s25 = smov [#allocation7]   ;;  %s5469_s27 = smov [#allocation10]  }
  0x34   :  { %s43_s26 = sshll.u32 %s5468_s25, 4  ;;  %s69_s28 = sshll.u32 %s5469_s27, 4  ;;  %s44_s26 = int_to_ptr.vmem [resolvable:$true] %s43_s26  ;;  %s70_s28 = int_to_ptr.vmem [resolvable:$true] %s69_s28 }
  0x35   :  { %s5413_s11 = scalar_lea.hbm %s5662_s2, 32768 }
  0x36   :  { %p5414_p10 = scmp.ne.s32.totalorder %s5662_s2, %s5413_s11  ;;  %p5417_p11 = scmp.lt.u32.totalorder %s5413_s11, %s5662_s2 }
  0x38   :  { %p5419_p12 = pnand %p5417_p11, %p5414_p10 }
  0x3a   :  { %5422 = shalt.err (!%p5419_p12)
}
  0x3b   :  { %s5423_s0 = scalar_lea.vmem %s44_s26, 32768  ;;  %p5428_p0 = scmp.lt.s32.totalorder %s44_s26, %s44_s26 }
  0x3c   :  { %p5424_p13 = scmp.ne.s32.totalorder %s44_s26, %s5423_s0  ;;  %p5429_p1 = scmp.lt.s32.totalorder %s5423_s0, %s5423_s0 }
  0x3e   :  { %p5430_p2 = por %p5429_p1, %p5428_p0 }
  0x40   :  { %p5431_p3 = pnand %p5430_p2, %p5424_p13 }
  0x42   :  { %5434 = shalt.err (!%p5431_p3)
}
  0x43   :  { %49 = dma.hbm_to_vmem [thread:$0]  %s5662_s2, 32768, %s44_s26, [#allocation6], %s5466_s10, %s5466_s10, %s5467_s12  }
  0x44   :  { %s5435_s19 = scalar_lea.hbm %s5665_s5, 16384 }
  0x45   :  { %p5436_p4 = scmp.ne.s32.totalorder %s5665_s5, %s5435_s19  ;;  %p5439_p5 = scmp.lt.u32.totalorder %s5435_s19, %s5665_s5 }
  0x47   :  { %p5441_p6 = pnand %p5439_p5, %p5436_p4 }
  0x49   :  { %5444 = shalt.err (!%p5441_p6)
}
  0x4a   :  { %s5445_s22 = scalar_lea.vmem %s70_s28, 16384  ;;  %p5450_p8 = scmp.lt.s32.totalorder %s70_s28, %s70_s28 }
  0x4b   :  { %p5446_p7 = scmp.ne.s32.totalorder %s70_s28, %s5445_s22  ;;  %p5451_p9 = scmp.lt.s32.totalorder %s5445_s22, %s5445_s22 }
  0x4d   :  { %p5452_p10 = por %p5451_p9, %p5450_p8 }
  0x4f   :  { %p5453_p11 = pnand %p5452_p10, %p5446_p7 }
  0x51   :  { %5456 = shalt.err (!%p5453_p11)
}
  0x52   :  { %75 = dma.hbm_to_vmem [thread:$0]  %s5665_s5, 16384, %s70_s28, [#allocation9], %s5466_s10, %s5466_s10, %s5467_s12  }
  0x53   :  { %5457 = dma.done.wait [#allocation4], 512  }
  0x54   :  { %5458 = vsyncadd [#allocation4], 4294966784 }
  0x55   :  { %5459 = dma.done.wait [#allocation6], 33280  }
  0x56   :  { %5460 = vsyncadd [#allocation6], 4294934016 }
  0x57   :  { %5461 = dma.done.wait [#allocation9], 32768  }
  0x58   :  { %5462 = vsyncadd [#allocation9], 4294934528  ;;  %v4571_v0 = vld [vmem:[#allocation7 + $0x4] ss:$16 sps:$4 sm:$0xff]   ;;  %v4573_v1 = vld [vmem:[#allocation7 + $0xc] ss:$16 sps:$4 sm:$0xff]  }
  0x59   :  { %1669 = vmatprep.subr.bf16.mxu0 %v4571_v0  ;;  %v4575_v2 = vld [vmem:[#allocation7] ss:$16 sps:$4 sm:$0xff]   ;;  %v4576_v3 = vld [vmem:[#allocation7 + $0x8] ss:$16 sps:$4 sm:$0xff]   ;;  %1833 = vmatprep.subr.bf16.mxu1 %v4573_v1  ;;  %v4577_v4 = vld [vmem:[#allocation7 + $0x24] ss:$16 sps:$4 sm:$0xff]  }
  0x5a   :  { %1670 = vmatpush1.bf16.msra.mxu0 %v4575_v2  ;;  %1834 = vmatpush1.bf16.msra.mxu1 %v4576_v3  ;;  %v4579_v5 = vld [vmem:[#allocation7 + $0x2c] ss:$16 sps:$4 sm:$0xff]   ;;  %v4581_v6 = vld [vmem:[#allocation7 + $0x20] ss:$16 sps:$4 sm:$0xff]   ;;  %v4582_v7 = vld [vmem:[#allocation7 + $0x28] ss:$16 sps:$4 sm:$0xff]  }
  0x5b   :  { %1671 = vmatprep.subr.bf16.mxu0 %v4577_v4  ;;  %1835 = vmatprep.subr.bf16.mxu1 %v4579_v5  ;;  %v4583_v8 = vld [vmem:[#allocation7 + $0x44] ss:$16 sps:$4 sm:$0xff]   ;;  %v4585_v9 = vld [vmem:[#allocation7 + $0x4c] ss:$16 sps:$4 sm:$0xff]   ;;  %v4587_v10 = vld [vmem:[#allocation7 + $0x40] ss:$16 sps:$4 sm:$0xff]  }
  0x5c   :  { %v4588_v11 = vld [vmem:[#allocation7 + $0x48] ss:$16 sps:$4 sm:$0xff]   ;;  %v4589_v12 = vld [vmem:[#allocation7 + $0x64] ss:$16 sps:$4 sm:$0xff]   ;;  %v4591_v13 = vld [vmem:[#allocation7 + $0x6c] ss:$16 sps:$4 sm:$0xff]  }
  0x5d   :  { %v4593_v14 = vld [vmem:[#allocation7 + $0x60] ss:$16 sps:$4 sm:$0xff]   ;;  %v4594_v15 = vld [vmem:[#allocation7 + $0x68] ss:$16 sps:$4 sm:$0xff]   ;;  %v4595_v16 = vld [vmem:[#allocation7 + $0x84] ss:$16 sps:$4 sm:$0xff]  }
  0x5e   :  { %1672 = vmatpush1.bf16.msra.mxu0 %v4581_v6  ;;  %1836 = vmatpush1.bf16.msra.mxu1 %v4582_v7  ;;  %v4597_v17 = vld [vmem:[#allocation7 + $0x8c] ss:$16 sps:$4 sm:$0xff]   ;;  %v4599_v18 = vld [vmem:[#allocation7 + $0x80] ss:$16 sps:$4 sm:$0xff]   ;;  %v4600_v19 = vld [vmem:[#allocation7 + $0x88] ss:$16 sps:$4 sm:$0xff]  }
  0x5f   :  { %1673 = vmatprep.subr.bf16.mxu0 %v4583_v8  ;;  %1837 = vmatprep.subr.bf16.mxu1 %v4585_v9  ;;  %v4601_v20 = vld [vmem:[#allocation7 + $0xa4] ss:$16 sps:$4 sm:$0xff]   ;;  %v4603_v21 = vld [vmem:[#allocation7 + $0xac] ss:$16 sps:$4 sm:$0xff]   ;;  %v4605_v22 = vld [vmem:[#allocation7 + $0xa0] ss:$16 sps:$4 sm:$0xff]  }
  0x60   :  { %v4606_v23 = vld [vmem:[#allocation7 + $0xa8] ss:$16 sps:$4 sm:$0xff]   ;;  %v4607_v24 = vld [vmem:[#allocation7 + $0xc4] ss:$16 sps:$4 sm:$0xff]   ;;  %v4609_v25 = vld [vmem:[#allocation7 + $0xcc] ss:$16 sps:$4 sm:$0xff]  }
  0x61   :  { %v4611_v26 = vld [vmem:[#allocation7 + $0xc0] ss:$16 sps:$4 sm:$0xff]   ;;  %v4612_v27 = vld [vmem:[#allocation7 + $0xc8] ss:$16 sps:$4 sm:$0xff]   ;;  %v4613_v28 = vld [vmem:[#allocation7 + $0xe4] ss:$16 sps:$4 sm:$0xff]  }
  0x62   :  { %1674 = vmatpush1.bf16.msra.mxu0 %v4587_v10  ;;  %1838 = vmatpush1.bf16.msra.mxu1 %v4588_v11  ;;  %v4615_v29 = vld [vmem:[#allocation7 + $0xec] ss:$16 sps:$4 sm:$0xff]   ;;  %v4617_v30 = vld [vmem:[#allocation7 + $0xe0] ss:$16 sps:$4 sm:$0xff]   ;;  %v4618_v31 = vld [vmem:[#allocation7 + $0xe8] ss:$16 sps:$4 sm:$0xff]  }
  0x63   :  { %1675 = vmatprep.subr.bf16.mxu0 %v4589_v12  ;;  %1839 = vmatprep.subr.bf16.mxu1 %v4591_v13  ;;  %v4619_v32 = vld [vmem:[#allocation7 + $0x104] ss:$16 sps:$4 sm:$0xff]   ;;  %v4621_v33 = vld [vmem:[#allocation7 + $0x10c] ss:$16 sps:$4 sm:$0xff]   ;;  %v4623_v34 = vld [vmem:[#allocation7 + $0x100] ss:$16 sps:$4 sm:$0xff]  }
  0x64   :  { %v4624_v35 = vld [vmem:[#allocation7 + $0x108] ss:$16 sps:$4 sm:$0xff]   ;;  %v4625_v36 = vld [vmem:[#allocation7 + $0x124] ss:$16 sps:$4 sm:$0xff]   ;;  %v4627_v37 = vld [vmem:[#allocation7 + $0x12c] ss:$16 sps:$4 sm:$0xff]  }
  0x65   :  { %v4629_v38 = vld [vmem:[#allocation7 + $0x120] ss:$16 sps:$4 sm:$0xff]   ;;  %v4630_v39 = vld [vmem:[#allocation7 + $0x128] ss:$16 sps:$4 sm:$0xff]   ;;  %v4631_v40 = vld [vmem:[#allocation7 + $0x144] ss:$16 sps:$4 sm:$0xff]  }
  0x66   :  { %1676 = vmatpush1.bf16.msra.mxu0 %v4593_v14  ;;  %1840 = vmatpush1.bf16.msra.mxu1 %v4594_v15  ;;  %v4633_v41 = vld [vmem:[#allocation7 + $0x14c] ss:$16 sps:$4 sm:$0xff]   ;;  %v4635_v42 = vld [vmem:[#allocation7 + $0x140] ss:$16 sps:$4 sm:$0xff]   ;;  %v4636_v43 = vld [vmem:[#allocation7 + $0x148] ss:$16 sps:$4 sm:$0xff]  }
  0x67   :  { %1677 = vmatprep.subr.bf16.mxu0 %v4595_v16  ;;  %1841 = vmatprep.subr.bf16.mxu1 %v4597_v17  ;;  %v4637_v44 = vld [vmem:[#allocation7 + $0x164] ss:$16 sps:$4 sm:$0xff]   ;;  %v4639_v45 = vld [vmem:[#allocation7 + $0x16c] ss:$16 sps:$4 sm:$0xff]   ;;  %v4641_v47 = vld [vmem:[#allocation7 + $0x160] ss:$16 sps:$4 sm:$0xff]  }
  0x68   :  { %v97_v46 = vld [vmem:[#allocation3] sm:$0xff]  ;;  %v4642_v49 = vld [vmem:[#allocation7 + $0x168] ss:$16 sps:$4 sm:$0xff]   ;;  %v4645_v51 = vld [vmem:[#allocation7 + $0x18c] ss:$16 sps:$4 sm:$0xff]   ;;  %vm3983_vm12 = vcmask 7168  }
  0x69   :  { %v3993_v48 = vcombine.high %v97_v46, %v97_v46  ;;  %v4643_v50 = vld [vmem:[#allocation7 + $0x184] ss:$16 sps:$4 sm:$0xff]   ;;  %v4647_v52 = vld [vmem:[#allocation7 + $0x180] ss:$16 sps:$4 sm:$0xff]   ;;  %v4648_v53 = vld [vmem:[#allocation7 + $0x188] ss:$16 sps:$4 sm:$0xff]   ;;  %v3992_v4 = vcombine.low %v97_v46, %v97_v46 }
  0x6a   :  { %1678 = vmatpush1.bf16.msra.mxu0 %v4599_v18  ;;  %1842 = vmatpush1.bf16.msra.mxu1 %v4600_v19  ;;  %v4649_v54 = vld [vmem:[#allocation7 + $0x1a4] ss:$16 sps:$4 sm:$0xff]   ;;  %v4651_v55 = vld [vmem:[#allocation7 + $0x1ac] ss:$16 sps:$4 sm:$0xff]   ;;  %v4653_v56 = vld [vmem:[#allocation7 + $0x1a0] ss:$16 sps:$4 sm:$0xff]  }
  0x6b   :  { %1679 = vmatprep.subr.bf16.mxu0 %v4601_v20  ;;  %1843 = vmatprep.subr.bf16.mxu1 %v4603_v21  ;;  %v4654_v57 = vld [vmem:[#allocation7 + $0x1a8] ss:$16 sps:$4 sm:$0xff]   ;;  %v4655_v58 = vld [vmem:[#allocation7 + $0x1c4] ss:$16 sps:$4 sm:$0xff]   ;;  %v4657_v59 = vld [vmem:[#allocation7 + $0x1cc] ss:$16 sps:$4 sm:$0xff]  }
  0x6c   :  { %1701 = vmatprep.mubr.bf16.mxu0 %v3993_v48  ;;  %1865 = vmatprep.mubr.bf16.mxu1 %v3993_v48  ;;  %v4659_v60 = vld [vmem:[#allocation7 + $0x1c0] ss:$16 sps:$4 sm:$0xff]   ;;  %v4660_v61 = vld [vmem:[#allocation7 + $0x1c8] ss:$16 sps:$4 sm:$0xff]   ;;  %v4661_v62 = vld [vmem:[#allocation7 + $0x1e4] ss:$16 sps:$4 sm:$0xff]  }
  0x6d   :  { %v4663_v63 = vld [vmem:[#allocation7 + $0x1ec] ss:$16 sps:$4 sm:$0xff]   ;;  %v4665_v0 = vld [vmem:[#allocation7 + $0x1e0] ss:$16 sps:$4 sm:$0xff]   ;;  %v4666_v1 = vld [vmem:[#allocation7 + $0x1e8] ss:$16 sps:$4 sm:$0xff]  }
  0x6e   :  { %1680 = vmatpush1.bf16.msra.mxu0 %v4605_v22  ;;  %1844 = vmatpush1.bf16.msra.mxu1 %v4606_v23  ;;  %v4671_v2 = vld [vmem:[#allocation7 + $0x204] ss:$16 sps:$4 sm:$0xff]   ;;  %v4674_v3 = vld [vmem:[#allocation7 + $0x20c] ss:$16 sps:$4 sm:$0xff]   ;;  %v4669_v5 = vld [vmem:[#allocation7 + $0x200] ss:$16 sps:$4 sm:$0xff]  }
  0x6f   :  { %1681 = vmatprep.subr.bf16.mxu0 %v4607_v24  ;;  %1845 = vmatprep.subr.bf16.mxu1 %v4609_v25  ;;  %v4672_v6 = vld [vmem:[#allocation7 + $0x208] ss:$16 sps:$4 sm:$0xff]   ;;  %v4677_v7 = vld [vmem:[#allocation7 + $0x224] ss:$16 sps:$4 sm:$0xff]   ;;  %v4680_v8 = vld [vmem:[#allocation7 + $0x22c] ss:$16 sps:$4 sm:$0xff]  }
  0x70   :  { %v4675_v9 = vld [vmem:[#allocation7 + $0x220] ss:$16 sps:$4 sm:$0xff]   ;;  %v4678_v10 = vld [vmem:[#allocation7 + $0x228] ss:$16 sps:$4 sm:$0xff]   ;;  %v4683_v11 = vld [vmem:[#allocation7 + $0x244] ss:$16 sps:$4 sm:$0xff]  }
  0x71   :  { %v4686_v12 = vld [vmem:[#allocation7 + $0x24c] ss:$16 sps:$4 sm:$0xff]   ;;  %v4681_v13 = vld [vmem:[#allocation7 + $0x240] ss:$16 sps:$4 sm:$0xff]   ;;  %v4684_v14 = vld [vmem:[#allocation7 + $0x248] ss:$16 sps:$4 sm:$0xff]  }
  0x72   :  { %1682 = vmatpush1.bf16.msra.mxu0 %v4611_v26  ;;  %1846 = vmatpush1.bf16.msra.mxu1 %v4612_v27  ;;  %v4689_v15 = vld [vmem:[#allocation7 + $0x264] ss:$16 sps:$4 sm:$0xff]   ;;  %v4692_v16 = vld [vmem:[#allocation7 + $0x26c] ss:$16 sps:$4 sm:$0xff]   ;;  %v4687_v17 = vld [vmem:[#allocation7 + $0x260] ss:$16 sps:$4 sm:$0xff]  }
  0x73   :  { %1683 = vmatprep.subr.bf16.mxu0 %v4613_v28  ;;  %1847 = vmatprep.subr.bf16.mxu1 %v4615_v29  ;;  %v4690_v18 = vld [vmem:[#allocation7 + $0x268] ss:$16 sps:$4 sm:$0xff]   ;;  %v4695_v19 = vld [vmem:[#allocation7 + $0x284] ss:$16 sps:$4 sm:$0xff]   ;;  %v4698_v20 = vld [vmem:[#allocation7 + $0x28c] ss:$16 sps:$4 sm:$0xff]  }
  0x74   :  { %v4693_v21 = vld [vmem:[#allocation7 + $0x280] ss:$16 sps:$4 sm:$0xff]   ;;  %v4696_v22 = vld [vmem:[#allocation7 + $0x288] ss:$16 sps:$4 sm:$0xff]   ;;  %v4701_v23 = vld [vmem:[#allocation7 + $0x2a4] ss:$16 sps:$4 sm:$0xff]  }
  0x75   :  { %v4704_v24 = vld [vmem:[#allocation7 + $0x2ac] ss:$16 sps:$4 sm:$0xff]   ;;  %v4699_v25 = vld [vmem:[#allocation7 + $0x2a0] ss:$16 sps:$4 sm:$0xff]   ;;  %v4702_v26 = vld [vmem:[#allocation7 + $0x2a8] ss:$16 sps:$4 sm:$0xff]  }
  0x76   :  { %1684 = vmatpush1.bf16.msra.mxu0 %v4617_v30  ;;  %1848 = vmatpush1.bf16.msra.mxu1 %v4618_v31  ;;  %v4707_v27 = vld [vmem:[#allocation7 + $0x2c4] ss:$16 sps:$4 sm:$0xff]   ;;  %v4710_v28 = vld [vmem:[#allocation7 + $0x2cc] ss:$16 sps:$4 sm:$0xff]   ;;  %v4705_v31 = vld [vmem:[#allocation7 + $0x2c0] ss:$16 sps:$4 sm:$0xff]  }
  0x77   :  { %1685 = vmatprep.subr.bf16.mxu0 %v4619_v32  ;;  %1849 = vmatprep.subr.bf16.mxu1 %v4621_v33  ;;  %v5589_v29 = vld [vmem:[#allocation3 + $0x8] sm:$0xff]  ;;  %v4713_v33 = vld [vmem:[#allocation7 + $0x2e4] ss:$16 sps:$4 sm:$0xff]  }
  0x78   :  { %v3995_v30 = vcombine.high %v5589_v29, %v5589_v29  ;;  %v4708_v32 = vld [vmem:[#allocation7 + $0x2c8] ss:$16 sps:$4 sm:$0xff]   ;;  %v4734_v46 = vld [vmem:[#allocation7 + $0x34c] ss:$16 sps:$4 sm:$0xff]  }
  0x79   :  { %v4732_v48 = vld [vmem:[#allocation7 + $0x348] ss:$16 sps:$4 sm:$0xff]  }
  0x7a   :  { %1686 = vmatpush1.bf16.msra.mxu0 %v4623_v34  ;;  %1850 = vmatpush1.bf16.msra.mxu1 %v4624_v35  ;;  %v4716_v34 = vld [vmem:[#allocation7 + $0x2ec] ss:$16 sps:$4 sm:$0xff]   ;;  %v4711_v35 = vld [vmem:[#allocation7 + $0x2e0] ss:$16 sps:$4 sm:$0xff]  }
  0x7b   :  { %1687 = vmatprep.subr.bf16.mxu0 %v4625_v36  ;;  %1851 = vmatprep.subr.bf16.mxu1 %v4627_v37  ;;  %v4714_v36 = vld [vmem:[#allocation7 + $0x2e8] ss:$16 sps:$4 sm:$0xff]   ;;  %v4719_v37 = vld [vmem:[#allocation7 + $0x304] ss:$16 sps:$4 sm:$0xff]  }
  0x7e   :  { %1688 = vmatpush1.bf16.msra.mxu0 %v4629_v38  ;;  %1852 = vmatpush1.bf16.msra.mxu1 %v4630_v39  ;;  %v4722_v38 = vld [vmem:[#allocation7 + $0x30c] ss:$16 sps:$4 sm:$0xff]   ;;  %v4717_v39 = vld [vmem:[#allocation7 + $0x300] ss:$16 sps:$4 sm:$0xff]  }
  0x7f   :  { %1689 = vmatprep.subr.bf16.mxu0 %v4631_v40  ;;  %1853 = vmatprep.subr.bf16.mxu1 %v4633_v41  ;;  %v4720_v40 = vld [vmem:[#allocation7 + $0x308] ss:$16 sps:$4 sm:$0xff]   ;;  %v4725_v41 = vld [vmem:[#allocation7 + $0x324] ss:$16 sps:$4 sm:$0xff]  }
  0x82   :  { %1690 = vmatpush1.bf16.msra.mxu0 %v4635_v42  ;;  %1854 = vmatpush1.bf16.msra.mxu1 %v4636_v43  ;;  %v4728_v42 = vld [vmem:[#allocation7 + $0x32c] ss:$16 sps:$4 sm:$0xff]   ;;  %v4723_v43 = vld [vmem:[#allocation7 + $0x320] ss:$16 sps:$4 sm:$0xff]  }
  0x83   :  { %1691 = vmatprep.subr.bf16.mxu0 %v4637_v44  ;;  %1855 = vmatprep.subr.bf16.mxu1 %v4639_v45  ;;  %v4726_v44 = vld [vmem:[#allocation7 + $0x328] ss:$16 sps:$4 sm:$0xff]   ;;  %v4731_v45 = vld [vmem:[#allocation7 + $0x344] ss:$16 sps:$4 sm:$0xff]  }
  0x86   :  { %1692 = vmatpush1.bf16.msra.mxu0 %v4641_v47  ;;  %1856 = vmatpush1.bf16.msra.mxu1 %v4642_v49  ;;  %v4729_v47 = vld [vmem:[#allocation7 + $0x340] ss:$16 sps:$4 sm:$0xff]   ;;  %v4737_v49 = vld [vmem:[#allocation7 + $0x364] ss:$16 sps:$4 sm:$0xff]  }
  0x87   :  { %1693 = vmatprep.subr.bf16.mxu0 %v4643_v50  ;;  %1857 = vmatprep.subr.bf16.mxu1 %v4645_v51  ;;  %v4740_v50 = vld [vmem:[#allocation7 + $0x36c] ss:$16 sps:$4 sm:$0xff]   ;;  %v4735_v51 = vld [vmem:[#allocation7 + $0x360] ss:$16 sps:$4 sm:$0xff]  }
  0x8a   :  { %1694 = vmatpush1.bf16.msra.mxu0 %v4647_v52  ;;  %1858 = vmatpush1.bf16.msra.mxu1 %v4648_v53  ;;  %v4738_v52 = vld [vmem:[#allocation7 + $0x368] ss:$16 sps:$4 sm:$0xff]   ;;  %v4743_v53 = vld [vmem:[#allocation7 + $0x384] ss:$16 sps:$4 sm:$0xff]  }
  0x8b   :  { %1695 = vmatprep.subr.bf16.mxu0 %v4649_v54  ;;  %1859 = vmatprep.subr.bf16.mxu1 %v4651_v55  ;;  %v4746_v54 = vld [vmem:[#allocation7 + $0x38c] ss:$16 sps:$4 sm:$0xff]   ;;  %v4741_v55 = vld [vmem:[#allocation7 + $0x380] ss:$16 sps:$4 sm:$0xff]  }
  0x8e   :  { %1696 = vmatpush1.bf16.msra.mxu0 %v4653_v56  ;;  %1860 = vmatpush1.bf16.msra.mxu1 %v4654_v57  ;;  %v4744_v56 = vld [vmem:[#allocation7 + $0x388] ss:$16 sps:$4 sm:$0xff]   ;;  %v4749_v57 = vld [vmem:[#allocation7 + $0x3a4] ss:$16 sps:$4 sm:$0xff]  }
  0x8f   :  { %1697 = vmatprep.subr.bf16.mxu0 %v4655_v58  ;;  %1861 = vmatprep.subr.bf16.mxu1 %v4657_v59  ;;  %v4752_v58 = vld [vmem:[#allocation7 + $0x3ac] ss:$16 sps:$4 sm:$0xff]   ;;  %v4747_v59 = vld [vmem:[#allocation7 + $0x3a0] ss:$16 sps:$4 sm:$0xff]  }
  0x92   :  { %1698 = vmatpush1.bf16.msra.mxu0 %v4659_v60  ;;  %1862 = vmatpush1.bf16.msra.mxu1 %v4660_v61  ;;  %v4750_v60 = vld [vmem:[#allocation7 + $0x3a8] ss:$16 sps:$4 sm:$0xff]   ;;  %v4755_v61 = vld [vmem:[#allocation7 + $0x3c4] ss:$16 sps:$4 sm:$0xff]  }
  0x93   :  { %1699 = vmatprep.subr.bf16.mxu0 %v4661_v62  ;;  %1863 = vmatprep.subr.bf16.mxu1 %v4663_v63  ;;  %v4758_v62 = vld [vmem:[#allocation7 + $0x3cc] ss:$16 sps:$4 sm:$0xff]   ;;  %v4753_v63 = vld [vmem:[#allocation7 + $0x3c0] ss:$16 sps:$4 sm:$0xff]  }
  0x96   :  { %1700 = vmatpush1.bf16.msra.mxu0 %v4665_v0  ;;  %1864 = vmatpush1.bf16.msra.mxu1 %v4666_v1  ;;  %v4756_v0 = vld [vmem:[#allocation7 + $0x3c8] ss:$16 sps:$4 sm:$0xff]   ;;  %v4761_v1 = vld [vmem:[#allocation7 + $0x3e4] ss:$16 sps:$4 sm:$0xff]  }
  0x97   :  { %1710 = vmatprep.subr.bf16.mxu0 %v4671_v2  ;;  %1874 = vmatprep.subr.bf16.mxu1 %v4674_v3  ;;  %v4764_v2 = vld [vmem:[#allocation7 + $0x3ec] ss:$16 sps:$4 sm:$0xff]   ;;  %v4759_v3 = vld [vmem:[#allocation7 + $0x3e0] ss:$16 sps:$4 sm:$0xff]  }
  0x99   :  { %1702 = vmatmul.mubr.bf16.vlgmr.msra.gmra.mrb[0].mxu0 %v3992_v4  ;;  %1866 = vmatmul.mubr.bf16.vlgmr.msra.gmra.mrb[0].mxu1 %v3992_v4  ;;  %v4762_v4 = vld [vmem:[#allocation7 + $0x3e8] ss:$16 sps:$4 sm:$0xff]  }
  0x9a   :  { %1711 = vmatpush1.bf16.msra.mxu0 %v4669_v5  ;;  %1875 = vmatpush1.bf16.msra.mxu1 %v4672_v6  ;;  %v4769_v5 = vld [vmem:[#allocation7 + $0x404] ss:$16 sps:$4 sm:$0xff]   ;;  %v4772_v6 = vld [vmem:[#allocation7 + $0x40c] ss:$16 sps:$4 sm:$0xff]  }
  0x9b   :  { %1712 = vmatprep.subr.bf16.mxu0 %v4677_v7  ;;  %1876 = vmatprep.subr.bf16.mxu1 %v4680_v8  ;;  %v3994_v7 = vcombine.low %v5589_v29, %v5589_v29  ;;  %v4767_v8 = vld [vmem:[#allocation7 + $0x400] ss:$16 sps:$4 sm:$0xff]   ;;  %v4802_v29 = vld [vmem:[#allocation7 + $0x4ac] ss:$16 sps:$4 sm:$0xff]  }
  0x9c   :  { %1742 = vmatprep.mubr.bf16.mxu0 %v3995_v30  ;;  %1906 = vmatprep.mubr.bf16.mxu1 %v3995_v30  ;;  %v4797_v30 = vld [vmem:[#allocation7 + $0x4a0] ss:$16 sps:$4 sm:$0xff]  }
  0x9e   :  { %1713 = vmatpush1.bf16.msra.mxu0 %v4675_v9  ;;  %1877 = vmatpush1.bf16.msra.mxu1 %v4678_v10  ;;  %v4770_v9 = vld [vmem:[#allocation7 + $0x408] ss:$16 sps:$4 sm:$0xff]   ;;  %v4775_v10 = vld [vmem:[#allocation7 + $0x424] ss:$16 sps:$4 sm:$0xff]  }
  0x9f   :  { %1714 = vmatprep.subr.bf16.mxu0 %v4683_v11  ;;  %1878 = vmatprep.subr.bf16.mxu1 %v4686_v12  ;;  %v5595_v11 = vld [vmem:[#allocation3 + $0x10] sm:$0xff]  ;;  %v4778_v12 = vld [vmem:[#allocation7 + $0x42c] ss:$16 sps:$4 sm:$0xff]  }
  0xa2   :  { %1715 = vmatpush1.bf16.msra.mxu0 %v4681_v13  ;;  %1879 = vmatpush1.bf16.msra.mxu1 %v4684_v14  ;;  %v3997_v13 = vcombine.high %v5595_v11, %v5595_v11  ;;  %v4773_v14 = vld [vmem:[#allocation7 + $0x420] ss:$16 sps:$4 sm:$0xff]  }
  0xa3   :  { %1716 = vmatprep.subr.bf16.mxu0 %v4689_v15  ;;  %1880 = vmatprep.subr.bf16.mxu1 %v4692_v16  ;;  %v4776_v15 = vld [vmem:[#allocation7 + $0x428] ss:$16 sps:$4 sm:$0xff]   ;;  %v4781_v16 = vld [vmem:[#allocation7 + $0x444] ss:$16 sps:$4 sm:$0xff]  }
  0xa6   :  { %1717 = vmatpush1.bf16.msra.mxu0 %v4687_v17  ;;  %1881 = vmatpush1.bf16.msra.mxu1 %v4690_v18  ;;  %v4784_v17 = vld [vmem:[#allocation7 + $0x44c] ss:$16 sps:$4 sm:$0xff]   ;;  %v4779_v18 = vld [vmem:[#allocation7 + $0x440] ss:$16 sps:$4 sm:$0xff]  }
  0xa7   :  { %1718 = vmatprep.subr.bf16.mxu0 %v4695_v19  ;;  %1882 = vmatprep.subr.bf16.mxu1 %v4698_v20  ;;  %v4782_v19 = vld [vmem:[#allocation7 + $0x448] ss:$16 sps:$4 sm:$0xff]   ;;  %v4787_v20 = vld [vmem:[#allocation7 + $0x464] ss:$16 sps:$4 sm:$0xff]  }
  0xaa   :  { %1719 = vmatpush1.bf16.msra.mxu0 %v4693_v21  ;;  %1883 = vmatpush1.bf16.msra.mxu1 %v4696_v22  ;;  %v4790_v21 = vld [vmem:[#allocation7 + $0x46c] ss:$16 sps:$4 sm:$0xff]   ;;  %v4785_v22 = vld [vmem:[#allocation7 + $0x460] ss:$16 sps:$4 sm:$0xff]  }
  0xab   :  { %1720 = vmatprep.subr.bf16.mxu0 %v4701_v23  ;;  %1884 = vmatprep.subr.bf16.mxu1 %v4704_v24  ;;  %v4788_v23 = vld [vmem:[#allocation7 + $0x468] ss:$16 sps:$4 sm:$0xff]   ;;  %v4793_v24 = vld [vmem:[#allocation7 + $0x484] ss:$16 sps:$4 sm:$0xff]  }
  0xae   :  { %1721 = vmatpush1.bf16.msra.mxu0 %v4699_v25  ;;  %1885 = vmatpush1.bf16.msra.mxu1 %v4702_v26  ;;  %v4796_v25 = vld [vmem:[#allocation7 + $0x48c] ss:$16 sps:$4 sm:$0xff]   ;;  %v4791_v26 = vld [vmem:[#allocation7 + $0x480] ss:$16 sps:$4 sm:$0xff]  }
  0xaf   :  { %1722 = vmatprep.subr.bf16.mxu0 %v4707_v27  ;;  %1886 = vmatprep.subr.bf16.mxu1 %v4710_v28  ;;  %v4794_v27 = vld [vmem:[#allocation7 + $0x488] ss:$16 sps:$4 sm:$0xff]   ;;  %v4799_v28 = vld [vmem:[#allocation7 + $0x4a4] ss:$16 sps:$4 sm:$0xff]  }
  0xb2   :  { %1723 = vmatpush1.bf16.msra.mxu0 %v4705_v31  ;;  %1887 = vmatpush1.bf16.msra.mxu1 %v4708_v32  ;;  %v4800_v31 = vld [vmem:[#allocation7 + $0x4a8] ss:$16 sps:$4 sm:$0xff]   ;;  %v4805_v32 = vld [vmem:[#allocation7 + $0x4c4] ss:$16 sps:$4 sm:$0xff]  }
  0xb3   :  { %1724 = vmatprep.subr.bf16.mxu0 %v4713_v33  ;;  %1888 = vmatprep.subr.bf16.mxu1 %v4716_v34  ;;  %v4808_v33 = vld [vmem:[#allocation7 + $0x4cc] ss:$16 sps:$4 sm:$0xff]   ;;  %v4803_v34 = vld [vmem:[#allocation7 + $0x4c0] ss:$16 sps:$4 sm:$0xff]  }
  0xb6   :  { %1725 = vmatpush1.bf16.msra.mxu0 %v4711_v35  ;;  %1889 = vmatpush1.bf16.msra.mxu1 %v4714_v36  ;;  %v4806_v35 = vld [vmem:[#allocation7 + $0x4c8] ss:$16 sps:$4 sm:$0xff]   ;;  %v4811_v36 = vld [vmem:[#allocation7 + $0x4e4] ss:$16 sps:$4 sm:$0xff]  }
  0xb7   :  { %1726 = vmatprep.subr.bf16.mxu0 %v4719_v37  ;;  %1890 = vmatprep.subr.bf16.mxu1 %v4722_v38  ;;  %v4814_v37 = vld [vmem:[#allocation7 + $0x4ec] ss:$16 sps:$4 sm:$0xff]   ;;  %v4809_v38 = vld [vmem:[#allocation7 + $0x4e0] ss:$16 sps:$4 sm:$0xff]  }
  0xba   :  { %1727 = vmatpush1.bf16.msra.mxu0 %v4717_v39  ;;  %1891 = vmatpush1.bf16.msra.mxu1 %v4720_v40  ;;  %v4812_v39 = vld [vmem:[#allocation7 + $0x4e8] ss:$16 sps:$4 sm:$0xff]   ;;  %v4817_v40 = vld [vmem:[#allocation7 + $0x504] ss:$16 sps:$4 sm:$0xff]  }
  0xbb   :  { %1728 = vmatprep.subr.bf16.mxu0 %v4725_v41  ;;  %1892 = vmatprep.subr.bf16.mxu1 %v4728_v42  ;;  %v4820_v41 = vld [vmem:[#allocation7 + $0x50c] ss:$16 sps:$4 sm:$0xff]   ;;  %v4815_v42 = vld [vmem:[#allocation7 + $0x500] ss:$16 sps:$4 sm:$0xff]  }
  0xbe   :  { %1729 = vmatpush1.bf16.msra.mxu0 %v4723_v43  ;;  %1893 = vmatpush1.bf16.msra.mxu1 %v4726_v44  ;;  %v4818_v43 = vld [vmem:[#allocation7 + $0x508] ss:$16 sps:$4 sm:$0xff]   ;;  %v4823_v44 = vld [vmem:[#allocation7 + $0x524] ss:$16 sps:$4 sm:$0xff]  }
  0xbf   :  { %1730 = vmatprep.subr.bf16.mxu0 %v4731_v45  ;;  %1894 = vmatprep.subr.bf16.mxu1 %v4734_v46  ;;  %v4826_v45 = vld [vmem:[#allocation7 + $0x52c] ss:$16 sps:$4 sm:$0xff]   ;;  %v4821_v46 = vld [vmem:[#allocation7 + $0x520] ss:$16 sps:$4 sm:$0xff]  }
  0xc2   :  { %1731 = vmatpush1.bf16.msra.mxu0 %v4729_v47  ;;  %1895 = vmatpush1.bf16.msra.mxu1 %v4732_v48  ;;  %v4824_v47 = vld [vmem:[#allocation7 + $0x528] ss:$16 sps:$4 sm:$0xff]   ;;  %v4829_v48 = vld [vmem:[#allocation7 + $0x544] ss:$16 sps:$4 sm:$0xff]  }
  0xc3   :  { %1732 = vmatprep.subr.bf16.mxu0 %v4737_v49  ;;  %1896 = vmatprep.subr.bf16.mxu1 %v4740_v50  ;;  %v4832_v49 = vld [vmem:[#allocation7 + $0x54c] ss:$16 sps:$4 sm:$0xff]   ;;  %v4827_v50 = vld [vmem:[#allocation7 + $0x540] ss:$16 sps:$4 sm:$0xff]  }
  0xc6   :  { %1733 = vmatpush1.bf16.msra.mxu0 %v4735_v51  ;;  %1897 = vmatpush1.bf16.msra.mxu1 %v4738_v52  ;;  %v4830_v51 = vld [vmem:[#allocation7 + $0x548] ss:$16 sps:$4 sm:$0xff]   ;;  %v4835_v52 = vld [vmem:[#allocation7 + $0x564] ss:$16 sps:$4 sm:$0xff]  }
  0xc7   :  { %1734 = vmatprep.subr.bf16.mxu0 %v4743_v53  ;;  %1898 = vmatprep.subr.bf16.mxu1 %v4746_v54  ;;  %v4838_v53 = vld [vmem:[#allocation7 + $0x56c] ss:$16 sps:$4 sm:$0xff]   ;;  %v4833_v54 = vld [vmem:[#allocation7 + $0x560] ss:$16 sps:$4 sm:$0xff]  }
  0xca   :  { %1735 = vmatpush1.bf16.msra.mxu0 %v4741_v55  ;;  %1899 = vmatpush1.bf16.msra.mxu1 %v4744_v56  ;;  %v4836_v55 = vld [vmem:[#allocation7 + $0x568] ss:$16 sps:$4 sm:$0xff]   ;;  %v4841_v56 = vld [vmem:[#allocation7 + $0x584] ss:$16 sps:$4 sm:$0xff]  }
  0xcb   :  { %1736 = vmatprep.subr.bf16.mxu0 %v4749_v57  ;;  %1900 = vmatprep.subr.bf16.mxu1 %v4752_v58  ;;  %v4844_v57 = vld [vmem:[#allocation7 + $0x58c] ss:$16 sps:$4 sm:$0xff]   ;;  %v4839_v58 = vld [vmem:[#allocation7 + $0x580] ss:$16 sps:$4 sm:$0xff]  }
  0xce   :  { %1737 = vmatpush1.bf16.msra.mxu0 %v4747_v59  ;;  %1901 = vmatpush1.bf16.msra.mxu1 %v4750_v60  ;;  %v4842_v59 = vld [vmem:[#allocation7 + $0x588] ss:$16 sps:$4 sm:$0xff]   ;;  %v4847_v60 = vld [vmem:[#allocation7 + $0x5a4] ss:$16 sps:$4 sm:$0xff]  }
  0xcf   :  { %1738 = vmatprep.subr.bf16.mxu0 %v4755_v61  ;;  %1902 = vmatprep.subr.bf16.mxu1 %v4758_v62  ;;  %v4850_v61 = vld [vmem:[#allocation7 + $0x5ac] ss:$16 sps:$4 sm:$0xff]   ;;  %v4845_v62 = vld [vmem:[#allocation7 + $0x5a0] ss:$16 sps:$4 sm:$0xff]  }
  0xd2   :  { %1739 = vmatpush1.bf16.msra.mxu0 %v4753_v63  ;;  %1903 = vmatpush1.bf16.msra.mxu1 %v4756_v0  ;;  %v4848_v63 = vld [vmem:[#allocation7 + $0x5a8] ss:$16 sps:$4 sm:$0xff]   ;;  %v4853_v0 = vld [vmem:[#allocation7 + $0x5c4] ss:$16 sps:$4 sm:$0xff]  }
  0xd3   :  { %1740 = vmatprep.subr.bf16.mxu0 %v4761_v1  ;;  %1904 = vmatprep.subr.bf16.mxu1 %v4764_v2  ;;  %v4856_v1 = vld [vmem:[#allocation7 + $0x5cc] ss:$16 sps:$4 sm:$0xff]   ;;  %v4851_v2 = vld [vmem:[#allocation7 + $0x5c0] ss:$16 sps:$4 sm:$0xff]  }
  0xd6   :  { %1741 = vmatpush1.bf16.msra.mxu0 %v4759_v3  ;;  %1905 = vmatpush1.bf16.msra.mxu1 %v4762_v4  ;;  %v4854_v3 = vld [vmem:[#allocation7 + $0x5c8] ss:$16 sps:$4 sm:$0xff]   ;;  %v4859_v4 = vld [vmem:[#allocation7 + $0x5e4] ss:$16 sps:$4 sm:$0xff]  }
  0xd7   :  { %1751 = vmatprep.subr.bf16.mxu0 %v4769_v5  ;;  %1915 = vmatprep.subr.bf16.mxu1 %v4772_v6  ;;  %v4862_v5 = vld [vmem:[#allocation7 + $0x5ec] ss:$16 sps:$4 sm:$0xff]   ;;  %v4857_v6 = vld [vmem:[#allocation7 + $0x5e0] ss:$16 sps:$4 sm:$0xff]  }
  0xd9   :  { %1743 = vmatmul.mubr.bf16.vlgmr.msra.gmra.mrb[0].mxu0 %v3994_v7  ;;  %1907 = vmatmul.mubr.bf16.vlgmr.msra.gmra.mrb[0].mxu1 %v3994_v7  ;;  %v4860_v7 = vld [vmem:[#allocation7 + $0x5e8] ss:$16 sps:$4 sm:$0xff]  }
  0xda   :  { %1752 = vmatpush1.bf16.msra.mxu0 %v4767_v8  ;;  %1916 = vmatpush1.bf16.msra.mxu1 %v4770_v9  ;;  %v4867_v8 = vld [vmem:[#allocation7 + $0x604] ss:$16 sps:$4 sm:$0xff]   ;;  %v4870_v9 = vld [vmem:[#allocation7 + $0x60c] ss:$16 sps:$4 sm:$0xff]  }
  0xdb   :  { %1753 = vmatprep.subr.bf16.mxu0 %v4775_v10  ;;  %1917 = vmatprep.subr.bf16.mxu1 %v4778_v12  ;;  %v4865_v10 = vld [vmem:[#allocation7 + $0x600] ss:$16 sps:$4 sm:$0xff]   ;;  %v3996_v12 = vcombine.low %v5595_v11, %v5595_v11  ;;  %v4882_v11 = vld [vmem:[#allocation7 + $0x64c] ss:$16 sps:$4 sm:$0xff]  }
  0xdc   :  { %1783 = vmatprep.mubr.bf16.mxu0 %v3997_v13  ;;  %1947 = vmatprep.mubr.bf16.mxu1 %v3997_v13  ;;  %v4868_v13 = vld [vmem:[#allocation7 + $0x608] ss:$16 sps:$4 sm:$0xff]  }
  0xde   :  { %1754 = vmatpush1.bf16.msra.mxu0 %v4773_v14  ;;  %1918 = vmatpush1.bf16.msra.mxu1 %v4776_v15  ;;  %v5601_v14 = vld [vmem:[#allocation3 + $0x18] sm:$0xff]  ;;  %v4873_v15 = vld [vmem:[#allocation7 + $0x624] ss:$16 sps:$4 sm:$0xff]  }
  0xdf   :  { %1755 = vmatprep.subr.bf16.mxu0 %v4781_v16  ;;  %1919 = vmatprep.subr.bf16.mxu1 %v4784_v17  ;;  %v4876_v16 = vld [vmem:[#allocation7 + $0x62c] ss:$16 sps:$4 sm:$0xff]   ;;  %v3999_v17 = vcombine.high %v5601_v14, %v5601_v14 }
  0xe2   :  { %1756 = vmatpush1.bf16.msra.mxu0 %v4779_v18  ;;  %1920 = vmatpush1.bf16.msra.mxu1 %v4782_v19  ;;  %v4871_v18 = vld [vmem:[#allocation7 + $0x620] ss:$16 sps:$4 sm:$0xff]   ;;  %v4874_v19 = vld [vmem:[#allocation7 + $0x628] ss:$16 sps:$4 sm:$0xff]  }
  0xe3   :  { %1757 = vmatprep.subr.bf16.mxu0 %v4787_v20  ;;  %1921 = vmatprep.subr.bf16.mxu1 %v4790_v21  ;;  %v4879_v20 = vld [vmem:[#allocation7 + $0x644] ss:$16 sps:$4 sm:$0xff]   ;;  %v4877_v21 = vld [vmem:[#allocation7 + $0x640] ss:$16 sps:$4 sm:$0xff]  }
  0xe6   :  { %1758 = vmatpush1.bf16.msra.mxu0 %v4785_v22  ;;  %1922 = vmatpush1.bf16.msra.mxu1 %v4788_v23  ;;  %v4880_v22 = vld [vmem:[#allocation7 + $0x648] ss:$16 sps:$4 sm:$0xff]   ;;  %v4885_v23 = vld [vmem:[#allocation7 + $0x664] ss:$16 sps:$4 sm:$0xff]  }
  0xe7   :  { %1759 = vmatprep.subr.bf16.mxu0 %v4793_v24  ;;  %1923 = vmatprep.subr.bf16.mxu1 %v4796_v25  ;;  %v4888_v24 = vld [vmem:[#allocation7 + $0x66c] ss:$16 sps:$4 sm:$0xff]   ;;  %v4883_v25 = vld [vmem:[#allocation7 + $0x660] ss:$16 sps:$4 sm:$0xff]  }
  0xea   :  { %1760 = vmatpush1.bf16.msra.mxu0 %v4791_v26  ;;  %1924 = vmatpush1.bf16.msra.mxu1 %v4794_v27  ;;  %v4886_v26 = vld [vmem:[#allocation7 + $0x668] ss:$16 sps:$4 sm:$0xff]   ;;  %v4891_v27 = vld [vmem:[#allocation7 + $0x684] ss:$16 sps:$4 sm:$0xff]  }
  0xeb   :  { %1761 = vmatprep.subr.bf16.mxu0 %v4799_v28  ;;  %1925 = vmatprep.subr.bf16.mxu1 %v4802_v29  ;;  %v4894_v28 = vld [vmem:[#allocation7 + $0x68c] ss:$16 sps:$4 sm:$0xff]   ;;  %v4889_v29 = vld [vmem:[#allocation7 + $0x680] ss:$16 sps:$4 sm:$0xff]  }
  0xee   :  { %1762 = vmatpush1.bf16.msra.mxu0 %v4797_v30  ;;  %1926 = vmatpush1.bf16.msra.mxu1 %v4800_v31  ;;  %v4892_v30 = vld [vmem:[#allocation7 + $0x688] ss:$16 sps:$4 sm:$0xff]   ;;  %v4897_v31 = vld [vmem:[#allocation7 + $0x6a4] ss:$16 sps:$4 sm:$0xff]  }
  0xef   :  { %1763 = vmatprep.subr.bf16.mxu0 %v4805_v32  ;;  %1927 = vmatprep.subr.bf16.mxu1 %v4808_v33  ;;  %v4900_v32 = vld [vmem:[#allocation7 + $0x6ac] ss:$16 sps:$4 sm:$0xff]   ;;  %v4895_v33 = vld [vmem:[#allocation7 + $0x6a0] ss:$16 sps:$4 sm:$0xff]  }
  0xf2   :  { %1764 = vmatpush1.bf16.msra.mxu0 %v4803_v34  ;;  %1928 = vmatpush1.bf16.msra.mxu1 %v4806_v35  ;;  %v4898_v34 = vld [vmem:[#allocation7 + $0x6a8] ss:$16 sps:$4 sm:$0xff]   ;;  %v4903_v35 = vld [vmem:[#allocation7 + $0x6c4] ss:$16 sps:$4 sm:$0xff]  }
  0xf3   :  { %1765 = vmatprep.subr.bf16.mxu0 %v4811_v36  ;;  %1929 = vmatprep.subr.bf16.mxu1 %v4814_v37  ;;  %v4906_v36 = vld [vmem:[#allocation7 + $0x6cc] ss:$16 sps:$4 sm:$0xff]   ;;  %v4901_v37 = vld [vmem:[#allocation7 + $0x6c0] ss:$16 sps:$4 sm:$0xff]  }
  0xf6   :  { %1766 = vmatpush1.bf16.msra.mxu0 %v4809_v38  ;;  %1930 = vmatpush1.bf16.msra.mxu1 %v4812_v39  ;;  %v4904_v38 = vld [vmem:[#allocation7 + $0x6c8] ss:$16 sps:$4 sm:$0xff]   ;;  %v4909_v39 = vld [vmem:[#allocation7 + $0x6e4] ss:$16 sps:$4 sm:$0xff]  }
  0xf7   :  { %1767 = vmatprep.subr.bf16.mxu0 %v4817_v40  ;;  %1931 = vmatprep.subr.bf16.mxu1 %v4820_v41  ;;  %v4912_v40 = vld [vmem:[#allocation7 + $0x6ec] ss:$16 sps:$4 sm:$0xff]   ;;  %v4907_v41 = vld [vmem:[#allocation7 + $0x6e0] ss:$16 sps:$4 sm:$0xff]  }
  0xfa   :  { %1768 = vmatpush1.bf16.msra.mxu0 %v4815_v42  ;;  %1932 = vmatpush1.bf16.msra.mxu1 %v4818_v43  ;;  %v4910_v42 = vld [vmem:[#allocation7 + $0x6e8] ss:$16 sps:$4 sm:$0xff]   ;;  %v4915_v43 = vld [vmem:[#allocation7 + $0x704] ss:$16 sps:$4 sm:$0xff]  }
  0xfb   :  { %1769 = vmatprep.subr.bf16.mxu0 %v4823_v44  ;;  %1933 = vmatprep.subr.bf16.mxu1 %v4826_v45  ;;  %v4918_v44 = vld [vmem:[#allocation7 + $0x70c] ss:$16 sps:$4 sm:$0xff]   ;;  %v4913_v45 = vld [vmem:[#allocation7 + $0x700] ss:$16 sps:$4 sm:$0xff]  }
  0xfe   :  { %1770 = vmatpush1.bf16.msra.mxu0 %v4821_v46  ;;  %1934 = vmatpush1.bf16.msra.mxu1 %v4824_v47  ;;  %v4916_v46 = vld [vmem:[#allocation7 + $0x708] ss:$16 sps:$4 sm:$0xff]   ;;  %v4921_v47 = vld [vmem:[#allocation7 + $0x724] ss:$16 sps:$4 sm:$0xff]  }
  0xff   :  { %1771 = vmatprep.subr.bf16.mxu0 %v4829_v48  ;;  %1935 = vmatprep.subr.bf16.mxu1 %v4832_v49  ;;  %v4924_v48 = vld [vmem:[#allocation7 + $0x72c] ss:$16 sps:$4 sm:$0xff]   ;;  %v4919_v49 = vld [vmem:[#allocation7 + $0x720] ss:$16 sps:$4 sm:$0xff]  }
 0x102   :  { %1772 = vmatpush1.bf16.msra.mxu0 %v4827_v50  ;;  %1936 = vmatpush1.bf16.msra.mxu1 %v4830_v51  ;;  %v4922_v50 = vld [vmem:[#allocation7 + $0x728] ss:$16 sps:$4 sm:$0xff]   ;;  %v4927_v51 = vld [vmem:[#allocation7 + $0x744] ss:$16 sps:$4 sm:$0xff]  }
 0x103   :  { %1773 = vmatprep.subr.bf16.mxu0 %v4835_v52  ;;  %1937 = vmatprep.subr.bf16.mxu1 %v4838_v53  ;;  %v4930_v52 = vld [vmem:[#allocation7 + $0x74c] ss:$16 sps:$4 sm:$0xff]   ;;  %v4925_v53 = vld [vmem:[#allocation7 + $0x740] ss:$16 sps:$4 sm:$0xff]  }
 0x106   :  { %1774 = vmatpush1.bf16.msra.mxu0 %v4833_v54  ;;  %1938 = vmatpush1.bf16.msra.mxu1 %v4836_v55  ;;  %v4928_v54 = vld [vmem:[#allocation7 + $0x748] ss:$16 sps:$4 sm:$0xff]   ;;  %v4933_v55 = vld [vmem:[#allocation7 + $0x764] ss:$16 sps:$4 sm:$0xff]  }
 0x107   :  { %1775 = vmatprep.subr.bf16.mxu0 %v4841_v56  ;;  %1939 = vmatprep.subr.bf16.mxu1 %v4844_v57  ;;  %v4936_v56 = vld [vmem:[#allocation7 + $0x76c] ss:$16 sps:$4 sm:$0xff]   ;;  %v4931_v57 = vld [vmem:[#allocation7 + $0x760] ss:$16 sps:$4 sm:$0xff]  }
 0x10a   :  { %1776 = vmatpush1.bf16.msra.mxu0 %v4839_v58  ;;  %1940 = vmatpush1.bf16.msra.mxu1 %v4842_v59  ;;  %v4934_v58 = vld [vmem:[#allocation7 + $0x768] ss:$16 sps:$4 sm:$0xff]   ;;  %v4939_v59 = vld [vmem:[#allocation7 + $0x784] ss:$16 sps:$4 sm:$0xff]  }
 0x10b   :  { %1777 = vmatprep.subr.bf16.mxu0 %v4847_v60  ;;  %1941 = vmatprep.subr.bf16.mxu1 %v4850_v61  ;;  %v4942_v60 = vld [vmem:[#allocation7 + $0x78c] ss:$16 sps:$4 sm:$0xff]   ;;  %v4937_v61 = vld [vmem:[#allocation7 + $0x780] ss:$16 sps:$4 sm:$0xff]  }
 0x10e   :  { %1778 = vmatpush1.bf16.msra.mxu0 %v4845_v62  ;;  %1942 = vmatpush1.bf16.msra.mxu1 %v4848_v63  ;;  %v4940_v62 = vld [vmem:[#allocation7 + $0x788] ss:$16 sps:$4 sm:$0xff]   ;;  %v4945_v63 = vld [vmem:[#allocation7 + $0x7a4] ss:$16 sps:$4 sm:$0xff]  }
 0x10f   :  { %1779 = vmatprep.subr.bf16.mxu0 %v4853_v0  ;;  %1943 = vmatprep.subr.bf16.mxu1 %v4856_v1  ;;  %v4948_v0 = vld [vmem:[#allocation7 + $0x7ac] ss:$16 sps:$4 sm:$0xff]   ;;  %v4943_v1 = vld [vmem:[#allocation7 + $0x7a0] ss:$16 sps:$4 sm:$0xff]  }
 0x112   :  { %1780 = vmatpush1.bf16.msra.mxu0 %v4851_v2  ;;  %1944 = vmatpush1.bf16.msra.mxu1 %v4854_v3  ;;  %v4946_v2 = vld [vmem:[#allocation7 + $0x7a8] ss:$16 sps:$4 sm:$0xff]   ;;  %v4951_v3 = vld [vmem:[#allocation7 + $0x7c4] ss:$16 sps:$4 sm:$0xff]  }
 0x113   :  { %1781 = vmatprep.subr.bf16.mxu0 %v4859_v4  ;;  %1945 = vmatprep.subr.bf16.mxu1 %v4862_v5  ;;  %v4954_v4 = vld [vmem:[#allocation7 + $0x7cc] ss:$16 sps:$4 sm:$0xff]   ;;  %v4949_v5 = vld [vmem:[#allocation7 + $0x7c0] ss:$16 sps:$4 sm:$0xff]  }
 0x116   :  { %1782 = vmatpush1.bf16.msra.mxu0 %v4857_v6  ;;  %1946 = vmatpush1.bf16.msra.mxu1 %v4860_v7  ;;  %v4952_v6 = vld [vmem:[#allocation7 + $0x7c8] ss:$16 sps:$4 sm:$0xff]   ;;  %v4957_v7 = vld [vmem:[#allocation7 + $0x7e4] ss:$16 sps:$4 sm:$0xff]  }
 0x117   :  { %1792 = vmatprep.subr.bf16.mxu0 %v4867_v8  ;;  %1956 = vmatprep.subr.bf16.mxu1 %v4870_v9  ;;  %v4960_v8 = vld [vmem:[#allocation7 + $0x7ec] ss:$16 sps:$4 sm:$0xff]   ;;  %v4955_v9 = vld [vmem:[#allocation7 + $0x7e0] ss:$16 sps:$4 sm:$0xff]  }
 0x119   :  { %1784 = vmatmul.mubr.bf16.vlgmr.msra.gmra.mrb[0].mxu0 %v3996_v12  ;;  %1948 = vmatmul.mubr.bf16.vlgmr.msra.gmra.mrb[0].mxu1 %v3996_v12  ;;  %v4965_v12 = vld [vmem:[#allocation8 + $0x4] ss:$16 sps:$4 sm:$0xff]  }
 0x11a   :  { %1793 = vmatpush1.bf16.msra.mxu0 %v4865_v10  ;;  %1957 = vmatpush1.bf16.msra.mxu1 %v4868_v13  ;;  %v4958_v10 = vld [vmem:[#allocation7 + $0x7e8] ss:$16 sps:$4 sm:$0xff]   ;;  %v4968_v13 = vld [vmem:[#allocation8 + $0xc] ss:$16 sps:$4 sm:$0xff]  }
 0x11b   :  { %1794 = vmatprep.subr.bf16.mxu0 %v4873_v15  ;;  %1958 = vmatprep.subr.bf16.mxu1 %v4876_v16  ;;  %v4963_v15 = vld [vmem:[#allocation8] ss:$16 sps:$4 sm:$0xff]   ;;  %v4966_v16 = vld [vmem:[#allocation8 + $0x8] ss:$16 sps:$4 sm:$0xff]  }
 0x11c   :  { %1824 = vmatprep.mubr.bf16.mxu0 %v3999_v17  ;;  %1988 = vmatprep.mubr.bf16.mxu1 %v3999_v17  ;;  %v3998_v17 = vcombine.low %v5601_v14, %v5601_v14  ;;  %v4986_v14 = vld [vmem:[#allocation8 + $0x6c] ss:$16 sps:$4 sm:$0xff]  }
 0x11e   :  { %1795 = vmatpush1.bf16.msra.mxu0 %v4871_v18  ;;  %1959 = vmatpush1.bf16.msra.mxu1 %v4874_v19  ;;  %v4971_v18 = vld [vmem:[#allocation8 + $0x24] ss:$16 sps:$4 sm:$0xff]   ;;  %v4974_v19 = vld [vmem:[#allocation8 + $0x2c] ss:$16 sps:$4 sm:$0xff]  }
 0x11f   :  { %1796 = vmatprep.subr.bf16.mxu0 %v4879_v20  ;;  %1960 = vmatprep.subr.bf16.mxu1 %v4882_v11  ;;  %v4969_v20 = vld [vmem:[#allocation8 + $0x20] ss:$16 sps:$4 sm:$0xff]   ;;  %v4972_v11 = vld [vmem:[#allocation8 + $0x28] ss:$16 sps:$4 sm:$0xff]  }
 0x122   :  { %1797 = vmatpush1.bf16.msra.mxu0 %v4877_v21  ;;  %1961 = vmatpush1.bf16.msra.mxu1 %v4880_v22  ;;  %v4977_v21 = vld [vmem:[#allocation8 + $0x44] ss:$16 sps:$4 sm:$0xff]   ;;  %v4980_v22 = vld [vmem:[#allocation8 + $0x4c] ss:$16 sps:$4 sm:$0xff]  }
 0x123   :  { %1798 = vmatprep.subr.bf16.mxu0 %v4885_v23  ;;  %1962 = vmatprep.subr.bf16.mxu1 %v4888_v24  ;;  %v4975_v23 = vld [vmem:[#allocation8 + $0x40] ss:$16 sps:$4 sm:$0xff]   ;;  %v4978_v24 = vld [vmem:[#allocation8 + $0x48] ss:$16 sps:$4 sm:$0xff]  }
 0x126   :  { %1799 = vmatpush1.bf16.msra.mxu0 %v4883_v25  ;;  %1963 = vmatpush1.bf16.msra.mxu1 %v4886_v26  ;;  %v4983_v25 = vld [vmem:[#allocation8 + $0x64] ss:$16 sps:$4 sm:$0xff]   ;;  %v4981_v26 = vld [vmem:[#allocation8 + $0x60] ss:$16 sps:$4 sm:$0xff]  }
 0x127   :  { %1800 = vmatprep.subr.bf16.mxu0 %v4891_v27  ;;  %1964 = vmatprep.subr.bf16.mxu1 %v4894_v28  ;;  %v4984_v27 = vld [vmem:[#allocation8 + $0x68] ss:$16 sps:$4 sm:$0xff]   ;;  %v4989_v28 = vld [vmem:[#allocation8 + $0x84] ss:$16 sps:$4 sm:$0xff]  }
 0x12a   :  { %1801 = vmatpush1.bf16.msra.mxu0 %v4889_v29  ;;  %1965 = vmatpush1.bf16.msra.mxu1 %v4892_v30  ;;  %v4992_v29 = vld [vmem:[#allocation8 + $0x8c] ss:$16 sps:$4 sm:$0xff]   ;;  %v4987_v30 = vld [vmem:[#allocation8 + $0x80] ss:$16 sps:$4 sm:$0xff]  }
 0x12b   :  { %1802 = vmatprep.subr.bf16.mxu0 %v4897_v31  ;;  %1966 = vmatprep.subr.bf16.mxu1 %v4900_v32  ;;  %v4990_v31 = vld [vmem:[#allocation8 + $0x88] ss:$16 sps:$4 sm:$0xff]   ;;  %v4995_v32 = vld [vmem:[#allocation8 + $0xa4] ss:$16 sps:$4 sm:$0xff]  }
 0x12e   :  { %1803 = vmatpush1.bf16.msra.mxu0 %v4895_v33  ;;  %1967 = vmatpush1.bf16.msra.mxu1 %v4898_v34  ;;  %v4998_v33 = vld [vmem:[#allocation8 + $0xac] ss:$16 sps:$4 sm:$0xff]   ;;  %v4993_v34 = vld [vmem:[#allocation8 + $0xa0] ss:$16 sps:$4 sm:$0xff]  }
 0x12f   :  { %1804 = vmatprep.subr.bf16.mxu0 %v4903_v35  ;;  %1968 = vmatprep.subr.bf16.mxu1 %v4906_v36  ;;  %v4996_v35 = vld [vmem:[#allocation8 + $0xa8] ss:$16 sps:$4 sm:$0xff]   ;;  %v5001_v36 = vld [vmem:[#allocation8 + $0xc4] ss:$16 sps:$4 sm:$0xff]  }
 0x132   :  { %1805 = vmatpush1.bf16.msra.mxu0 %v4901_v37  ;;  %1969 = vmatpush1.bf16.msra.mxu1 %v4904_v38  ;;  %v5004_v37 = vld [vmem:[#allocation8 + $0xcc] ss:$16 sps:$4 sm:$0xff]   ;;  %v4999_v38 = vld [vmem:[#allocation8 + $0xc0] ss:$16 sps:$4 sm:$0xff]  }
 0x133   :  { %1806 = vmatprep.subr.bf16.mxu0 %v4909_v39  ;;  %1970 = vmatprep.subr.bf16.mxu1 %v4912_v40  ;;  %v5002_v39 = vld [vmem:[#allocation8 + $0xc8] ss:$16 sps:$4 sm:$0xff]   ;;  %v5007_v40 = vld [vmem:[#allocation8 + $0xe4] ss:$16 sps:$4 sm:$0xff]  }
 0x136   :  { %1807 = vmatpush1.bf16.msra.mxu0 %v4907_v41  ;;  %1971 = vmatpush1.bf16.msra.mxu1 %v4910_v42  ;;  %v5010_v41 = vld [vmem:[#allocation8 + $0xec] ss:$16 sps:$4 sm:$0xff]   ;;  %v5005_v42 = vld [vmem:[#allocation8 + $0xe0] ss:$16 sps:$4 sm:$0xff]  }
 0x137   :  { %1808 = vmatprep.subr.bf16.mxu0 %v4915_v43  ;;  %1972 = vmatprep.subr.bf16.mxu1 %v4918_v44  ;;  %v5008_v43 = vld [vmem:[#allocation8 + $0xe8] ss:$16 sps:$4 sm:$0xff]   ;;  %v5013_v44 = vld [vmem:[#allocation8 + $0x104] ss:$16 sps:$4 sm:$0xff]  }
 0x13a   :  { %1809 = vmatpush1.bf16.msra.mxu0 %v4913_v45  ;;  %1973 = vmatpush1.bf16.msra.mxu1 %v4916_v46  ;;  %v5016_v45 = vld [vmem:[#allocation8 + $0x10c] ss:$16 sps:$4 sm:$0xff]   ;;  %v5011_v46 = vld [vmem:[#allocation8 + $0x100] ss:$16 sps:$4 sm:$0xff]  }
 0x13b   :  { %1810 = vmatprep.subr.bf16.mxu0 %v4921_v47  ;;  %1974 = vmatprep.subr.bf16.mxu1 %v4924_v48  ;;  %v5014_v47 = vld [vmem:[#allocation8 + $0x108] ss:$16 sps:$4 sm:$0xff]   ;;  %v5019_v48 = vld [vmem:[#allocation8 + $0x124] ss:$16 sps:$4 sm:$0xff]  }
 0x13e   :  { %1811 = vmatpush1.bf16.msra.mxu0 %v4919_v49  ;;  %1975 = vmatpush1.bf16.msra.mxu1 %v4922_v50  ;;  %v5022_v49 = vld [vmem:[#allocation8 + $0x12c] ss:$16 sps:$4 sm:$0xff]   ;;  %v5017_v50 = vld [vmem:[#allocation8 + $0x120] ss:$16 sps:$4 sm:$0xff]  }
 0x13f   :  { %1812 = vmatprep.subr.bf16.mxu0 %v4927_v51  ;;  %1976 = vmatprep.subr.bf16.mxu1 %v4930_v52  ;;  %v5020_v51 = vld [vmem:[#allocation8 + $0x128] ss:$16 sps:$4 sm:$0xff]   ;;  %v5025_v52 = vld [vmem:[#allocation8 + $0x144] ss:$16 sps:$4 sm:$0xff]  }
 0x142   :  { %1813 = vmatpush1.bf16.msra.mxu0 %v4925_v53  ;;  %1977 = vmatpush1.bf16.msra.mxu1 %v4928_v54  ;;  %v5028_v53 = vld [vmem:[#allocation8 + $0x14c] ss:$16 sps:$4 sm:$0xff]   ;;  %v5023_v54 = vld [vmem:[#allocation8 + $0x140] ss:$16 sps:$4 sm:$0xff]  }
 0x143   :  { %1814 = vmatprep.subr.bf16.mxu0 %v4933_v55  ;;  %1978 = vmatprep.subr.bf16.mxu1 %v4936_v56  ;;  %v5026_v55 = vld [vmem:[#allocation8 + $0x148] ss:$16 sps:$4 sm:$0xff]   ;;  %v5031_v56 = vld [vmem:[#allocation8 + $0x164] ss:$16 sps:$4 sm:$0xff]  }
 0x146   :  { %1815 = vmatpush1.bf16.msra.mxu0 %v4931_v57  ;;  %1979 = vmatpush1.bf16.msra.mxu1 %v4934_v58  ;;  %v5034_v57 = vld [vmem:[#allocation8 + $0x16c] ss:$16 sps:$4 sm:$0xff]   ;;  %v5029_v58 = vld [vmem:[#allocation8 + $0x160] ss:$16 sps:$4 sm:$0xff]  }
 0x147   :  { %1816 = vmatprep.subr.bf16.mxu0 %v4939_v59  ;;  %1980 = vmatprep.subr.bf16.mxu1 %v4942_v60  ;;  %v5032_v59 = vld [vmem:[#allocation8 + $0x168] ss:$16 sps:$4 sm:$0xff]   ;;  %v5037_v60 = vld [vmem:[#allocation8 + $0x184] ss:$16 sps:$4 sm:$0xff]  }
 0x14a   :  { %1817 = vmatpush1.bf16.msra.mxu0 %v4937_v61  ;;  %1981 = vmatpush1.bf16.msra.mxu1 %v4940_v62  ;;  %v5040_v61 = vld [vmem:[#allocation8 + $0x18c] ss:$16 sps:$4 sm:$0xff]   ;;  %v5035_v62 = vld [vmem:[#allocation8 + $0x180] ss:$16 sps:$4 sm:$0xff]  }
 0x14b   :  { %1818 = vmatprep.subr.bf16.mxu0 %v4945_v63  ;;  %1982 = vmatprep.subr.bf16.mxu1 %v4948_v0  ;;  %v5038_v63 = vld [vmem:[#allocation8 + $0x188] ss:$16 sps:$4 sm:$0xff]   ;;  %v5043_v0 = vld [vmem:[#allocation8 + $0x1a4] ss:$16 sps:$4 sm:$0xff]  }
 0x14e   :  { %1819 = vmatpush1.bf16.msra.mxu0 %v4943_v1  ;;  %1983 = vmatpush1.bf16.msra.mxu1 %v4946_v2  ;;  %v5046_v1 = vld [vmem:[#allocation8 + $0x1ac] ss:$16 sps:$4 sm:$0xff]   ;;  %v5041_v2 = vld [vmem:[#allocation8 + $0x1a0] ss:$16 sps:$4 sm:$0xff]  }
 0x14f   :  { %1820 = vmatprep.subr.bf16.mxu0 %v4951_v3  ;;  %1984 = vmatprep.subr.bf16.mxu1 %v4954_v4  ;;  %v5044_v3 = vld [vmem:[#allocation8 + $0x1a8] ss:$16 sps:$4 sm:$0xff]   ;;  %v5049_v4 = vld [vmem:[#allocation8 + $0x1c4] ss:$16 sps:$4 sm:$0xff]  }
 0x152   :  { %1821 = vmatpush1.bf16.msra.mxu0 %v4949_v5  ;;  %1985 = vmatpush1.bf16.msra.mxu1 %v4952_v6  ;;  %v5052_v5 = vld [vmem:[#allocation8 + $0x1cc] ss:$16 sps:$4 sm:$0xff]   ;;  %v5047_v6 = vld [vmem:[#allocation8 + $0x1c0] ss:$16 sps:$4 sm:$0xff]  }
 0x153   :  { %1822 = vmatprep.subr.bf16.mxu0 %v4957_v7  ;;  %1986 = vmatprep.subr.bf16.mxu1 %v4960_v8  ;;  %v5050_v7 = vld [vmem:[#allocation8 + $0x1c8] ss:$16 sps:$4 sm:$0xff]   ;;  %v5055_v8 = vld [vmem:[#allocation8 + $0x1e4] ss:$16 sps:$4 sm:$0xff]  }
 0x156   :  { %1823 = vmatpush1.bf16.msra.mxu0 %v4955_v9  ;;  %1987 = vmatpush1.bf16.msra.mxu1 %v4958_v10  ;;  %v5058_v9 = vld [vmem:[#allocation8 + $0x1ec] ss:$16 sps:$4 sm:$0xff]   ;;  %v5053_v10 = vld [vmem:[#allocation8 + $0x1e0] ss:$16 sps:$4 sm:$0xff]  }
 0x157   :  { %2803 = vmatprep.subr.bf16.mxu0 %v4965_v12  ;;  %2885 = vmatprep.subr.bf16.mxu1 %v4968_v13  ;;  %v5056_v12 = vld [vmem:[#allocation8 + $0x1e8] ss:$16 sps:$4 sm:$0xff]   ;;  %v5061_v13 = vld [vmem:[#allocation8 + $0x204] ss:$16 sps:$4 sm:$0xff]  }
 0x159   :  { %1825 = vmatmul.mubr.bf16.vlgmr.msra.gmra.mrb[0].mxu0 %v3998_v17  ;;  %1989 = vmatmul.mubr.bf16.vlgmr.msra.gmra.mrb[0].mxu1 %v3998_v17  ;;  %v358_v17 = vld [vmem:[#allocation5 + $0x8] sm:$0xff] }
 0x15a   :  { %2804 = vmatpush1.bf16.msra.mxu0 %v4963_v15  ;;  %2886 = vmatpush1.bf16.msra.mxu1 %v4966_v16  ;;  %v5064_v15 = vld [vmem:[#allocation8 + $0x20c] ss:$16 sps:$4 sm:$0xff]   ;;  %v357_v16 = vld [vmem:[#allocation5] sm:$0xff] }
 0x15b   :  { %2805 = vmatprep.subr.bf16.mxu0 %v4971_v18  ;;  %2887 = vmatprep.subr.bf16.mxu1 %v4974_v19  ;;  %v360_v18 = vld [vmem:[#allocation5 + $0x18] sm:$0xff] }
 0x15e   :  { %2806 = vmatpush1.bf16.msra.mxu0 %v4969_v20  ;;  %2888 = vmatpush1.bf16.msra.mxu1 %v4972_v11 }
 0x15f   :  { %2807 = vmatprep.subr.bf16.mxu0 %v4977_v21  ;;  %2889 = vmatprep.subr.bf16.mxu1 %v4980_v22 }
 0x162   :  { %2808 = vmatpush1.bf16.msra.mxu0 %v4975_v23  ;;  %2890 = vmatpush1.bf16.msra.mxu1 %v4978_v24 }
 0x163   :  { %2809 = vmatprep.subr.bf16.mxu0 %v4983_v25  ;;  %2891 = vmatprep.subr.bf16.mxu1 %v4986_v14 }
 0x166   :  { %2810 = vmatpush1.bf16.msra.mxu0 %v4981_v26  ;;  %2892 = vmatpush1.bf16.msra.mxu1 %v4984_v27 }
 0x167   :  { %2811 = vmatprep.subr.bf16.mxu0 %v4989_v28  ;;  %2893 = vmatprep.subr.bf16.mxu1 %v4992_v29 }
 0x16a   :  { %2812 = vmatpush1.bf16.msra.mxu0 %v4987_v30  ;;  %2894 = vmatpush1.bf16.msra.mxu1 %v4990_v31 }
 0x16b   :  { %2813 = vmatprep.subr.bf16.mxu0 %v4995_v32  ;;  %2895 = vmatprep.subr.bf16.mxu1 %v4998_v33 }
 0x16e   :  { %2814 = vmatpush1.bf16.msra.mxu0 %v4993_v34  ;;  %2896 = vmatpush1.bf16.msra.mxu1 %v4996_v35  ;;  %v5059_v34 = vld [vmem:[#allocation8 + $0x200] ss:$16 sps:$4 sm:$0xff]   ;;  %v5062_v35 = vld [vmem:[#allocation8 + $0x208] ss:$16 sps:$4 sm:$0xff]  }
 0x16f   :  { %2815 = vmatprep.subr.bf16.mxu0 %v5001_v36  ;;  %2897 = vmatprep.subr.bf16.mxu1 %v5004_v37 }
 0x172   :  { %2816 = vmatpush1.bf16.msra.mxu0 %v4999_v38  ;;  %2898 = vmatpush1.bf16.msra.mxu1 %v5002_v39  ;;  %v5067_v38 = vld [vmem:[#allocation8 + $0x224] ss:$16 sps:$4 sm:$0xff]   ;;  %v5070_v39 = vld [vmem:[#allocation8 + $0x22c] ss:$16 sps:$4 sm:$0xff]  }
 0x173   :  { %2817 = vmatprep.subr.bf16.mxu0 %v5007_v40  ;;  %2899 = vmatprep.subr.bf16.mxu1 %v5010_v41  ;;  %v5065_v41 = vld [vmem:[#allocation8 + $0x220] ss:$16 sps:$4 sm:$0xff]  }
 0x176   :  { %2818 = vmatpush1.bf16.msra.mxu0 %v5005_v42  ;;  %2900 = vmatpush1.bf16.msra.mxu1 %v5008_v43  ;;  %v5068_v42 = vld [vmem:[#allocation8 + $0x228] ss:$16 sps:$4 sm:$0xff]   ;;  %v5073_v43 = vld [vmem:[#allocation8 + $0x244] ss:$16 sps:$4 sm:$0xff]  }
 0x177   :  { %2819 = vmatprep.subr.bf16.mxu0 %v5013_v44  ;;  %2901 = vmatprep.subr.bf16.mxu1 %v5016_v45  ;;  %v5076_v44 = vld [vmem:[#allocation8 + $0x24c] ss:$16 sps:$4 sm:$0xff]   ;;  %v5071_v45 = vld [vmem:[#allocation8 + $0x240] ss:$16 sps:$4 sm:$0xff]  }
 0x17a   :  { %2820 = vmatpush1.bf16.msra.mxu0 %v5011_v46  ;;  %2902 = vmatpush1.bf16.msra.mxu1 %v5014_v47  ;;  %v5074_v46 = vld [vmem:[#allocation8 + $0x248] ss:$16 sps:$4 sm:$0xff]   ;;  %v5079_v47 = vld [vmem:[#allocation8 + $0x264] ss:$16 sps:$4 sm:$0xff]  }
 0x17b   :  { %2821 = vmatprep.subr.bf16.mxu0 %v5019_v48  ;;  %2903 = vmatprep.subr.bf16.mxu1 %v5022_v49  ;;  %v5082_v48 = vld [vmem:[#allocation8 + $0x26c] ss:$16 sps:$4 sm:$0xff]   ;;  %v5077_v49 = vld [vmem:[#allocation8 + $0x260] ss:$16 sps:$4 sm:$0xff]  }
 0x17e   :  { %2822 = vmatpush1.bf16.msra.mxu0 %v5017_v50  ;;  %2904 = vmatpush1.bf16.msra.mxu1 %v5020_v51  ;;  %v5080_v50 = vld [vmem:[#allocation8 + $0x268] ss:$16 sps:$4 sm:$0xff]   ;;  %v5085_v51 = vld [vmem:[#allocation8 + $0x284] ss:$16 sps:$4 sm:$0xff]  }
 0x17f   :  { %2823 = vmatprep.subr.bf16.mxu0 %v5025_v52  ;;  %2905 = vmatprep.subr.bf16.mxu1 %v5028_v53  ;;  %v5088_v52 = vld [vmem:[#allocation8 + $0x28c] ss:$16 sps:$4 sm:$0xff]   ;;  %v5083_v53 = vld [vmem:[#allocation8 + $0x280] ss:$16 sps:$4 sm:$0xff]  }
 0x182   :  { %2824 = vmatpush1.bf16.msra.mxu0 %v5023_v54  ;;  %2906 = vmatpush1.bf16.msra.mxu1 %v5026_v55  ;;  %v5086_v54 = vld [vmem:[#allocation8 + $0x288] ss:$16 sps:$4 sm:$0xff]   ;;  %v5091_v55 = vld [vmem:[#allocation8 + $0x2a4] ss:$16 sps:$4 sm:$0xff]  }
 0x183   :  { %2825 = vmatprep.subr.bf16.mxu0 %v5031_v56  ;;  %2907 = vmatprep.subr.bf16.mxu1 %v5034_v57  ;;  %v5094_v56 = vld [vmem:[#allocation8 + $0x2ac] ss:$16 sps:$4 sm:$0xff]   ;;  %v5089_v57 = vld [vmem:[#allocation8 + $0x2a0] ss:$16 sps:$4 sm:$0xff]  }
 0x186   :  { %2826 = vmatpush1.bf16.msra.mxu0 %v5029_v58  ;;  %2908 = vmatpush1.bf16.msra.mxu1 %v5032_v59  ;;  %v5092_v58 = vld [vmem:[#allocation8 + $0x2a8] ss:$16 sps:$4 sm:$0xff]   ;;  %v5097_v59 = vld [vmem:[#allocation8 + $0x2c4] ss:$16 sps:$4 sm:$0xff]  }
 0x187   :  { %2827 = vmatprep.subr.bf16.mxu0 %v5037_v60  ;;  %2909 = vmatprep.subr.bf16.mxu1 %v5040_v61  ;;  %v5100_v60 = vld [vmem:[#allocation8 + $0x2cc] ss:$16 sps:$4 sm:$0xff]   ;;  %v5095_v61 = vld [vmem:[#allocation8 + $0x2c0] ss:$16 sps:$4 sm:$0xff]  }
 0x18a   :  { %2828 = vmatpush1.bf16.msra.mxu0 %v5035_v62  ;;  %2910 = vmatpush1.bf16.msra.mxu1 %v5038_v63  ;;  %v5098_v62 = vld [vmem:[#allocation8 + $0x2c8] ss:$16 sps:$4 sm:$0xff]   ;;  %v5103_v63 = vld [vmem:[#allocation8 + $0x2e4] ss:$16 sps:$4 sm:$0xff]  }
 0x18b   :  { %2829 = vmatprep.subr.bf16.mxu0 %v5043_v0  ;;  %2911 = vmatprep.subr.bf16.mxu1 %v5046_v1  ;;  %v5106_v0 = vld [vmem:[#allocation8 + $0x2ec] ss:$16 sps:$4 sm:$0xff]   ;;  %v5101_v1 = vld [vmem:[#allocation8 + $0x2e0] ss:$16 sps:$4 sm:$0xff]  }
 0x18e   :  { %2830 = vmatpush1.bf16.msra.mxu0 %v5041_v2  ;;  %2912 = vmatpush1.bf16.msra.mxu1 %v5044_v3  ;;  %v5104_v2 = vld [vmem:[#allocation8 + $0x2e8] ss:$16 sps:$4 sm:$0xff]   ;;  %v5109_v3 = vld [vmem:[#allocation8 + $0x304] ss:$16 sps:$4 sm:$0xff]  }
 0x18f   :  { %2831 = vmatprep.subr.bf16.mxu0 %v5049_v4  ;;  %2913 = vmatprep.subr.bf16.mxu1 %v5052_v5  ;;  %v5112_v4 = vld [vmem:[#allocation8 + $0x30c] ss:$16 sps:$4 sm:$0xff]   ;;  %v5107_v5 = vld [vmem:[#allocation8 + $0x300] ss:$16 sps:$4 sm:$0xff]  }
 0x192   :  { %2832 = vmatpush1.bf16.msra.mxu0 %v5047_v6  ;;  %2914 = vmatpush1.bf16.msra.mxu1 %v5050_v7  ;;  %v5110_v6 = vld [vmem:[#allocation8 + $0x308] ss:$16 sps:$4 sm:$0xff]   ;;  %v5115_v7 = vld [vmem:[#allocation8 + $0x324] ss:$16 sps:$4 sm:$0xff]  }
 0x193   :  { %2833 = vmatprep.subr.bf16.mxu0 %v5055_v8  ;;  %2915 = vmatprep.subr.bf16.mxu1 %v5058_v9  ;;  %v5118_v8 = vld [vmem:[#allocation8 + $0x32c] ss:$16 sps:$4 sm:$0xff]   ;;  %v5113_v9 = vld [vmem:[#allocation8 + $0x320] ss:$16 sps:$4 sm:$0xff]  }
 0x196   :  { %2834 = vmatpush1.bf16.msra.mxu0 %v5053_v10  ;;  %2916 = vmatpush1.bf16.msra.mxu1 %v5056_v12  ;;  %v5116_v10 = vld [vmem:[#allocation8 + $0x328] ss:$16 sps:$4 sm:$0xff]   ;;  %v5121_v12 = vld [vmem:[#allocation8 + $0x344] ss:$16 sps:$4 sm:$0xff]  }
 0x197   :  { %2844 = vmatprep.subr.bf16.mxu0 %v5061_v13  ;;  %2926 = vmatprep.subr.bf16.mxu1 %v5064_v15  ;;  %v5124_v13 = vld [vmem:[#allocation8 + $0x34c] ss:$16 sps:$4 sm:$0xff]   ;;  %v5119_v15 = vld [vmem:[#allocation8 + $0x340] ss:$16 sps:$4 sm:$0xff]  }
 0x22c   :  { %v1826_v19 = vpop.f32.mrb[0].mxu0  ;;  %v5607_v20 = vpop.f32.mrb[0].mxu1 }
 0x22d   :  { %v4512_v11 = vadd.f32 %v1826_v19, %v357_v16  ;;  %v1828_v21 = vpop.f32.mrb[1].mxu0  ;;  %v1992_v22 = vpop.f32.mrb[1].mxu1  ;;  %v5122_v16 = vld [vmem:[#allocation8 + $0x348] ss:$16 sps:$4 sm:$0xff]   ;;  %v5125_v19 = vld [vmem:[#allocation8 + $0x360] ss:$16 sps:$4 sm:$0xff]  }
 0x22e   :  { %v4513_v23 = vadd.f32 %v1828_v21, %v358_v17  ;;  %v4515_v24 = vadd.f32 %v1992_v22, %v360_v18  ;;  %v1830_v25 = vpop.f32.mrb[2].mxu0  ;;  %v1994_v14 = vpop.f32.mrb[2].mxu1  ;;  %v5127_v17 = vld [vmem:[#allocation8 + $0x364] ss:$16 sps:$4 sm:$0xff]   ;;  %v5130_v18 = vld [vmem:[#allocation8 + $0x36c] ss:$16 sps:$4 sm:$0xff]  }
 0x22f   :  { %vm1997_vm0 = vcmp.gt.f32.partialorder %v4512_v11, 0.0  ;;  %v2001_v26 = vmul.f32 0.2, %v4512_v11  ;;  %v1831_v30 = vpop.f32.mrb[3].mxu0  ;;  %v1995_v31 = vpop.f32.mrb[3].mxu1 }
 0x230   :  { %vm1998_vm1 = vcmp.gt.f32.partialorder %v4513_v23, 0.0  ;;  %v2002_v27 = vmul.f32 0.2, %v4513_v23  ;;  %vm2000_vm2 = vcmp.gt.f32.partialorder %v4515_v24, 0.0  ;;  %v2004_v28 = vmul.f32 0.2, %v4515_v24 }
 0x231   :  { %v2005_v29 = vsel %vm1997_vm0, %v4512_v11, %v2001_v26  ;;  %v5128_v11 = vld [vmem:[#allocation8 + $0x368] ss:$16 sps:$4 sm:$0xff]   ;;  %v5133_v21 = vld [vmem:[#allocation8 + $0x384] ss:$16 sps:$4 sm:$0xff]   ;;  %v5136_v22 = vld [vmem:[#allocation8 + $0x38c] ss:$16 sps:$4 sm:$0xff]  }
 0x232   :  { %v2006_v32 = vsel %vm1998_vm1, %v4513_v23, %v2002_v27  ;;  %v2008_v36 = vsel %vm2000_vm2, %v4515_v24, %v2004_v28  ;;  %v2009_v37 = vpack.c.bf16 %v2005_v29, %v2005_v29  ;;  %v5131_v23 = vld [vmem:[#allocation8 + $0x380] ss:$16 sps:$4 sm:$0xff]   ;;  %v5134_v24 = vld [vmem:[#allocation8 + $0x388] ss:$16 sps:$4 sm:$0xff]   ;;  %v5139_v25 = vld [vmem:[#allocation8 + $0x3a4] ss:$16 sps:$4 sm:$0xff]  }
 0x233   :  { %v2010_v33 = vpack.c.bf16 %v2006_v32, %v2006_v32  ;;  %v2012_v40 = vpack.c.bf16 %v2008_v36, %v2008_v36  ;;  %v5142_v14 = vld [vmem:[#allocation8 + $0x3ac] ss:$16 sps:$4 sm:$0xff]   ;;  %v359_v26 = vld [vmem:[#allocation5 + $0x10] sm:$0xff]  ;;  %v5140_v28 = vld [vmem:[#allocation8 + $0x3a8] ss:$16 sps:$4 sm:$0xff]  }
 0x234   :  { %v5137_v27 = vld [vmem:[#allocation8 + $0x3a0] ss:$16 sps:$4 sm:$0xff]   ;;  %v5145_v29 = vld [vmem:[#allocation8 + $0x3c4] ss:$16 sps:$4 sm:$0xff]   ;;  %v5148_v30 = vld [vmem:[#allocation8 + $0x3cc] ss:$16 sps:$4 sm:$0xff]   ;;  %v4514_v31 = vadd.f32 %v5607_v20, %v359_v26 }
 0x235   :  { %2835 = vmatprep.mubr.bf16.mxu0 %v2010_v33  ;;  %2917 = vmatprep.mubr.bf16.mxu1 %v2010_v33  ;;  %v5143_v32 = vld [vmem:[#allocation8 + $0x3c0] ss:$16 sps:$4 sm:$0xff]   ;;  %v5146_v33 = vld [vmem:[#allocation8 + $0x3c8] ss:$16 sps:$4 sm:$0xff]   ;;  %v5232_v26 = vld [vmem:[#allocation10 + $0x18c] ss:$16 sps:$4 sm:$0xff]  }
 0x236   :  { %2836 = vmatmul.mubr.bf16.vlgmr.msra.gmra.mrb[4].mxu0 %v2009_v37  ;;  %2918 = vmatmul.mubr.bf16.vlgmr.msra.gmra.mrb[4].mxu1 %v2009_v37  ;;  %v2003_v36 = vmul.f32 0.2, %v4514_v31  ;;  %vm1999_vm3 = vcmp.gt.f32.partialorder %v4514_v31, 0.0  ;;  %v5149_v37 = vld [vmem:[#allocation8 + $0x3e0] ss:$16 sps:$4 sm:$0xff]  }
 0x237   :  { %2845 = vmatpush1.bf16.msra.mxu0 %v5059_v34  ;;  %2927 = vmatpush1.bf16.msra.mxu1 %v5062_v35  ;;  %v5151_v34 = vld [vmem:[#allocation8 + $0x3e4] ss:$16 sps:$4 sm:$0xff]   ;;  %v5154_v35 = vld [vmem:[#allocation8 + $0x3ec] ss:$16 sps:$4 sm:$0xff]   ;;  %v5155_v20 = vld [vmem:[#allocation10] ss:$16 sps:$4 sm:$0xff]  }
 0x238   :  { %2876 = vmatprep.mubr.bf16.mxu0 %v2012_v40  ;;  %2958 = vmatprep.mubr.bf16.mxu1 %v2012_v40  ;;  %v5160_v40 = vld [vmem:[#allocation10 + $0xc] ss:$16 sps:$4 sm:$0xff]  }
 0x239   :  { %2846 = vmatprep.subr.bf16.mxu0 %v5067_v38  ;;  %2928 = vmatprep.subr.bf16.mxu1 %v5070_v39  ;;  %v5152_v38 = vld [vmem:[#allocation8 + $0x3e8] ss:$16 sps:$4 sm:$0xff]   ;;  %v5157_v39 = vld [vmem:[#allocation10 + $0x4] ss:$16 sps:$4 sm:$0xff]  }
 0x23b   :  { %2847 = vmatpush1.bf16.msra.mxu0 %v5065_v41  ;;  %2929 = vmatpush1.bf16.msra.mxu1 %v5068_v42  ;;  %v2007_v41 = vsel %vm1999_vm3, %v4514_v31, %v2003_v36  ;;  %v5158_v42 = vld [vmem:[#allocation10 + $0x8] ss:$16 sps:$4 sm:$0xff]   ;;  %v5233_v31 = vld [vmem:[#allocation10 + $0x1a0] ss:$16 sps:$4 sm:$0xff]  }
 0x23c   :  { %2848 = vmatprep.subr.bf16.mxu0 %v5073_v43  ;;  %2930 = vmatprep.subr.bf16.mxu1 %v5076_v44  ;;  %v2011_v43 = vpack.c.bf16 %v2007_v41, %v2007_v41  ;;  %v5163_v44 = vld [vmem:[#allocation10 + $0x24] ss:$16 sps:$4 sm:$0xff]   ;;  %v5242_v36 = vld [vmem:[#allocation10 + $0x1c8] ss:$16 sps:$4 sm:$0xff]  }
 0x23d   :  { %v5253_v41 = vld [vmem:[#allocation10 + $0x204] ss:$16 sps:$4 sm:$0xff]  }
 0x23f   :  { %2849 = vmatpush1.bf16.msra.mxu0 %v5071_v45  ;;  %2931 = vmatpush1.bf16.msra.mxu1 %v5074_v46  ;;  %v5166_v45 = vld [vmem:[#allocation10 + $0x2c] ss:$16 sps:$4 sm:$0xff]   ;;  %v5161_v46 = vld [vmem:[#allocation10 + $0x20] ss:$16 sps:$4 sm:$0xff]  }
 0x240   :  { %2850 = vmatprep.subr.bf16.mxu0 %v5079_v47  ;;  %2932 = vmatprep.subr.bf16.mxu1 %v5082_v48  ;;  %v5164_v47 = vld [vmem:[#allocation10 + $0x28] ss:$16 sps:$4 sm:$0xff]   ;;  %v5169_v48 = vld [vmem:[#allocation10 + $0x44] ss:$16 sps:$4 sm:$0xff]  }
 0x243   :  { %2851 = vmatpush1.bf16.msra.mxu0 %v5077_v49  ;;  %2933 = vmatpush1.bf16.msra.mxu1 %v5080_v50  ;;  %v5172_v49 = vld [vmem:[#allocation10 + $0x4c] ss:$16 sps:$4 sm:$0xff]   ;;  %v5167_v50 = vld [vmem:[#allocation10 + $0x40] ss:$16 sps:$4 sm:$0xff]  }
 0x244   :  { %2852 = vmatprep.subr.bf16.mxu0 %v5085_v51  ;;  %2934 = vmatprep.subr.bf16.mxu1 %v5088_v52  ;;  %v5170_v51 = vld [vmem:[#allocation10 + $0x48] ss:$16 sps:$4 sm:$0xff]   ;;  %v5175_v52 = vld [vmem:[#allocation10 + $0x64] ss:$16 sps:$4 sm:$0xff]  }
 0x247   :  { %2853 = vmatpush1.bf16.msra.mxu0 %v5083_v53  ;;  %2935 = vmatpush1.bf16.msra.mxu1 %v5086_v54  ;;  %v5178_v53 = vld [vmem:[#allocation10 + $0x6c] ss:$16 sps:$4 sm:$0xff]   ;;  %v5173_v54 = vld [vmem:[#allocation10 + $0x60] ss:$16 sps:$4 sm:$0xff]  }
 0x248   :  { %2854 = vmatprep.subr.bf16.mxu0 %v5091_v55  ;;  %2936 = vmatprep.subr.bf16.mxu1 %v5094_v56  ;;  %v5176_v55 = vld [vmem:[#allocation10 + $0x68] ss:$16 sps:$4 sm:$0xff]   ;;  %v5181_v56 = vld [vmem:[#allocation10 + $0x84] ss:$16 sps:$4 sm:$0xff]  }
 0x24b   :  { %2855 = vmatpush1.bf16.msra.mxu0 %v5089_v57  ;;  %2937 = vmatpush1.bf16.msra.mxu1 %v5092_v58  ;;  %v5184_v57 = vld [vmem:[#allocation10 + $0x8c] ss:$16 sps:$4 sm:$0xff]   ;;  %v5179_v58 = vld [vmem:[#allocation10 + $0x80] ss:$16 sps:$4 sm:$0xff]  }
 0x24c   :  { %2856 = vmatprep.subr.bf16.mxu0 %v5097_v59  ;;  %2938 = vmatprep.subr.bf16.mxu1 %v5100_v60  ;;  %v5182_v59 = vld [vmem:[#allocation10 + $0x88] ss:$16 sps:$4 sm:$0xff]   ;;  %v5187_v60 = vld [vmem:[#allocation10 + $0xa4] ss:$16 sps:$4 sm:$0xff]  }
 0x24f   :  { %2857 = vmatpush1.bf16.msra.mxu0 %v5095_v61  ;;  %2939 = vmatpush1.bf16.msra.mxu1 %v5098_v62  ;;  %v5190_v61 = vld [vmem:[#allocation10 + $0xac] ss:$16 sps:$4 sm:$0xff]   ;;  %v5185_v62 = vld [vmem:[#allocation10 + $0xa0] ss:$16 sps:$4 sm:$0xff]  }
 0x250   :  { %2858 = vmatprep.subr.bf16.mxu0 %v5103_v63  ;;  %2940 = vmatprep.subr.bf16.mxu1 %v5106_v0  ;;  %v5188_v63 = vld [vmem:[#allocation10 + $0xa8] ss:$16 sps:$4 sm:$0xff]   ;;  %v5193_v0 = vld [vmem:[#allocation10 + $0xc4] ss:$16 sps:$4 sm:$0xff]  }
 0x253   :  { %2859 = vmatpush1.bf16.msra.mxu0 %v5101_v1  ;;  %2941 = vmatpush1.bf16.msra.mxu1 %v5104_v2  ;;  %v5196_v1 = vld [vmem:[#allocation10 + $0xcc] ss:$16 sps:$4 sm:$0xff]   ;;  %v5191_v2 = vld [vmem:[#allocation10 + $0xc0] ss:$16 sps:$4 sm:$0xff]  }
 0x254   :  { %2860 = vmatprep.subr.bf16.mxu0 %v5109_v3  ;;  %2942 = vmatprep.subr.bf16.mxu1 %v5112_v4  ;;  %v5194_v3 = vld [vmem:[#allocation10 + $0xc8] ss:$16 sps:$4 sm:$0xff]   ;;  %v5199_v4 = vld [vmem:[#allocation10 + $0xe4] ss:$16 sps:$4 sm:$0xff]  }
 0x257   :  { %2861 = vmatpush1.bf16.msra.mxu0 %v5107_v5  ;;  %2943 = vmatpush1.bf16.msra.mxu1 %v5110_v6  ;;  %v5202_v5 = vld [vmem:[#allocation10 + $0xec] ss:$16 sps:$4 sm:$0xff]   ;;  %v5197_v6 = vld [vmem:[#allocation10 + $0xe0] ss:$16 sps:$4 sm:$0xff]  }
 0x258   :  { %2862 = vmatprep.subr.bf16.mxu0 %v5115_v7  ;;  %2944 = vmatprep.subr.bf16.mxu1 %v5118_v8  ;;  %v5200_v7 = vld [vmem:[#allocation10 + $0xe8] ss:$16 sps:$4 sm:$0xff]   ;;  %v5205_v8 = vld [vmem:[#allocation10 + $0x104] ss:$16 sps:$4 sm:$0xff]  }
 0x25b   :  { %2863 = vmatpush1.bf16.msra.mxu0 %v5113_v9  ;;  %2945 = vmatpush1.bf16.msra.mxu1 %v5116_v10  ;;  %v5208_v9 = vld [vmem:[#allocation10 + $0x10c] ss:$16 sps:$4 sm:$0xff]   ;;  %v5203_v10 = vld [vmem:[#allocation10 + $0x100] ss:$16 sps:$4 sm:$0xff]  }
 0x25c   :  { %2864 = vmatprep.subr.bf16.mxu0 %v5121_v12  ;;  %2946 = vmatprep.subr.bf16.mxu1 %v5124_v13  ;;  %v5206_v12 = vld [vmem:[#allocation10 + $0x108] ss:$16 sps:$4 sm:$0xff]   ;;  %v5211_v13 = vld [vmem:[#allocation10 + $0x124] ss:$16 sps:$4 sm:$0xff]  }
 0x25f   :  { %2865 = vmatpush1.bf16.msra.mxu0 %v5119_v15  ;;  %2947 = vmatpush1.bf16.msra.mxu1 %v5122_v16  ;;  %v5214_v15 = vld [vmem:[#allocation10 + $0x12c] ss:$16 sps:$4 sm:$0xff]   ;;  %v5209_v16 = vld [vmem:[#allocation10 + $0x120] ss:$16 sps:$4 sm:$0xff]  }
 0x260   :  { %2866 = vmatprep.subr.bf16.mxu0 %v5127_v17  ;;  %2948 = vmatprep.subr.bf16.mxu1 %v5130_v18  ;;  %v5212_v17 = vld [vmem:[#allocation10 + $0x128] ss:$16 sps:$4 sm:$0xff]   ;;  %v5217_v18 = vld [vmem:[#allocation10 + $0x144] ss:$16 sps:$4 sm:$0xff]  }
 0x263   :  { %2867 = vmatpush1.bf16.msra.mxu0 %v5125_v19  ;;  %2949 = vmatpush1.bf16.msra.mxu1 %v5128_v11  ;;  %v5220_v19 = vld [vmem:[#allocation10 + $0x14c] ss:$16 sps:$4 sm:$0xff]   ;;  %v5215_v11 = vld [vmem:[#allocation10 + $0x140] ss:$16 sps:$4 sm:$0xff]  }
 0x264   :  { %2868 = vmatprep.subr.bf16.mxu0 %v5133_v21  ;;  %2950 = vmatprep.subr.bf16.mxu1 %v5136_v22  ;;  %v5218_v21 = vld [vmem:[#allocation10 + $0x148] ss:$16 sps:$4 sm:$0xff]   ;;  %v5223_v22 = vld [vmem:[#allocation10 + $0x164] ss:$16 sps:$4 sm:$0xff]  }
 0x267   :  { %2869 = vmatpush1.bf16.msra.mxu0 %v5131_v23  ;;  %2951 = vmatpush1.bf16.msra.mxu1 %v5134_v24  ;;  %v5226_v23 = vld [vmem:[#allocation10 + $0x16c] ss:$16 sps:$4 sm:$0xff]   ;;  %v5221_v24 = vld [vmem:[#allocation10 + $0x160] ss:$16 sps:$4 sm:$0xff]  }
 0x268   :  { %2870 = vmatprep.subr.bf16.mxu0 %v5139_v25  ;;  %2952 = vmatprep.subr.bf16.mxu1 %v5142_v14  ;;  %v5224_v25 = vld [vmem:[#allocation10 + $0x168] ss:$16 sps:$4 sm:$0xff]   ;;  %v5229_v14 = vld [vmem:[#allocation10 + $0x184] ss:$16 sps:$4 sm:$0xff]  }
 0x26b   :  { %2871 = vmatpush1.bf16.msra.mxu0 %v5137_v27  ;;  %2953 = vmatpush1.bf16.msra.mxu1 %v5140_v28  ;;  %v5227_v27 = vld [vmem:[#allocation10 + $0x180] ss:$16 sps:$4 sm:$0xff]   ;;  %v5230_v28 = vld [vmem:[#allocation10 + $0x188] ss:$16 sps:$4 sm:$0xff]  }
 0x26c   :  { %2872 = vmatprep.subr.bf16.mxu0 %v5145_v29  ;;  %2954 = vmatprep.subr.bf16.mxu1 %v5148_v30  ;;  %v5235_v29 = vld [vmem:[#allocation10 + $0x1a4] ss:$16 sps:$4 sm:$0xff]   ;;  %v5238_v30 = vld [vmem:[#allocation10 + $0x1ac] ss:$16 sps:$4 sm:$0xff]  }
 0x26f   :  { %2873 = vmatpush1.bf16.msra.mxu0 %v5143_v32  ;;  %2955 = vmatpush1.bf16.msra.mxu1 %v5146_v33  ;;  %v5236_v32 = vld [vmem:[#allocation10 + $0x1a8] ss:$16 sps:$4 sm:$0xff]   ;;  %v5241_v33 = vld [vmem:[#allocation10 + $0x1c4] ss:$16 sps:$4 sm:$0xff]  }
 0x270   :  { %2874 = vmatprep.subr.bf16.mxu0 %v5151_v34  ;;  %2956 = vmatprep.subr.bf16.mxu1 %v5154_v35  ;;  %v5244_v34 = vld [vmem:[#allocation10 + $0x1cc] ss:$16 sps:$4 sm:$0xff]   ;;  %v5239_v35 = vld [vmem:[#allocation10 + $0x1c0] ss:$16 sps:$4 sm:$0xff]  }
 0x273   :  { %2875 = vmatpush1.bf16.msra.mxu0 %v5149_v37  ;;  %2957 = vmatpush1.bf16.msra.mxu1 %v5152_v38  ;;  %v5247_v37 = vld [vmem:[#allocation10 + $0x1e4] ss:$16 sps:$4 sm:$0xff]   ;;  %v5250_v38 = vld [vmem:[#allocation10 + $0x1ec] ss:$16 sps:$4 sm:$0xff]  }
 0x274   :  { %3773 = vmatprep.subr.bf16.mxu0 %v5157_v39  ;;  %3855 = vmatprep.subr.bf16.mxu1 %v5160_v40  ;;  %v5245_v39 = vld [vmem:[#allocation10 + $0x1e0] ss:$16 sps:$4 sm:$0xff]   ;;  %v5248_v40 = vld [vmem:[#allocation10 + $0x1e8] ss:$16 sps:$4 sm:$0xff]  }
 0x276   :  { %2877 = vmatmul.mubr.bf16.vlgmr.msra.gmra.mrb[4].mxu0 %v2011_v43  ;;  %2959 = vmatmul.mubr.bf16.vlgmr.msra.gmra.mrb[4].mxu1 %v2011_v43 }
 0x277   :  { %3774 = vmatpush1.bf16.msra.mxu0 %v5155_v20  ;;  %3856 = vmatpush1.bf16.msra.mxu1 %v5158_v42  ;;  %v5256_v20 = vld [vmem:[#allocation10 + $0x20c] ss:$16 sps:$4 sm:$0xff]   ;;  %v2143_v42 = vlaneseq }
 0x278   :  { %3775 = vmatprep.subr.bf16.mxu0 %v5163_v44  ;;  %3857 = vmatprep.subr.bf16.mxu1 %v5166_v45  ;;  %v5618_v45 = vld [vmem:[%s5664_s4] sm:$0xf] }
 0x279   :  { %v5610_v43 = vshrl.u32 %v2143_v42, 7  ;;  %v5310_v42 = vld [vmem:[#allocation10 + $0x32c] ss:$16 sps:$4 sm:$0xff]  }
 0x27b   :  { %3776 = vmatpush1.bf16.msra.mxu0 %v5161_v46  ;;  %3858 = vmatpush1.bf16.msra.mxu1 %v5164_v47  ;;  %v5613_v44 = vsub.s32 0, %v5610_v43  ;;  %v5621_v46 = vsub.s32 1, %v5610_v43  ;;  %v5624_v47 = vsub.s32 3, %v5610_v43 }
 0x27c   :  { %3777 = vmatprep.subr.bf16.mxu0 %v5169_v48  ;;  %3859 = vmatprep.subr.bf16.mxu1 %v5172_v49 }
 0x27d   :  { %v2146_v48 = vrot.slane %v5618_v45, %v5613_v44  ;;  %v2150_v49 = vrot.slane %v5618_v45, %v5621_v46 }
 0x27f   :  { %3778 = vmatpush1.bf16.msra.mxu0 %v5167_v50  ;;  %3860 = vmatpush1.bf16.msra.mxu1 %v5170_v51  ;;  %v2158_v50 = vrot.slane %v5618_v45, %v5624_v47 }
 0x280   :  { %3779 = vmatprep.subr.bf16.mxu0 %v5175_v52  ;;  %3861 = vmatprep.subr.bf16.mxu1 %v5178_v53 }
 0x283   :  { %3780 = vmatpush1.bf16.msra.mxu0 %v5173_v54  ;;  %3862 = vmatpush1.bf16.msra.mxu1 %v5176_v55 }
 0x284   :  { %3781 = vmatprep.subr.bf16.mxu0 %v5181_v56  ;;  %3863 = vmatprep.subr.bf16.mxu1 %v5184_v57 }
 0x287   :  { %3782 = vmatpush1.bf16.msra.mxu0 %v5179_v58  ;;  %3864 = vmatpush1.bf16.msra.mxu1 %v5182_v59 }
 0x288   :  { %3783 = vmatprep.subr.bf16.mxu0 %v5187_v60  ;;  %3865 = vmatprep.subr.bf16.mxu1 %v5190_v61 }
 0x28b   :  { %3784 = vmatpush1.bf16.msra.mxu0 %v5185_v62  ;;  %3866 = vmatpush1.bf16.msra.mxu1 %v5188_v63 }
 0x28c   :  { %3785 = vmatprep.subr.bf16.mxu0 %v5193_v0  ;;  %3867 = vmatprep.subr.bf16.mxu1 %v5196_v1 }
 0x28f   :  { %3786 = vmatpush1.bf16.msra.mxu0 %v5191_v2  ;;  %3868 = vmatpush1.bf16.msra.mxu1 %v5194_v3 }
 0x290   :  { %3787 = vmatprep.subr.bf16.mxu0 %v5199_v4  ;;  %3869 = vmatprep.subr.bf16.mxu1 %v5202_v5  ;;  %v5251_v4 = vld [vmem:[#allocation10 + $0x200] ss:$16 sps:$4 sm:$0xff]   ;;  %v5254_v5 = vld [vmem:[#allocation10 + $0x208] ss:$16 sps:$4 sm:$0xff]  }
 0x293   :  { %3788 = vmatpush1.bf16.msra.mxu0 %v5197_v6  ;;  %3870 = vmatpush1.bf16.msra.mxu1 %v5200_v7 }
 0x294   :  { %3789 = vmatprep.subr.bf16.mxu0 %v5205_v8  ;;  %3871 = vmatprep.subr.bf16.mxu1 %v5208_v9  ;;  %v5259_v8 = vld [vmem:[#allocation10 + $0x224] ss:$16 sps:$4 sm:$0xff]   ;;  %v5262_v9 = vld [vmem:[#allocation10 + $0x22c] ss:$16 sps:$4 sm:$0xff]  }
 0x297   :  { %3790 = vmatpush1.bf16.msra.mxu0 %v5203_v10  ;;  %3872 = vmatpush1.bf16.msra.mxu1 %v5206_v12  ;;  %v5257_v12 = vld [vmem:[#allocation10 + $0x220] ss:$16 sps:$4 sm:$0xff]  }
 0x298   :  { %3791 = vmatprep.subr.bf16.mxu0 %v5211_v13  ;;  %3873 = vmatprep.subr.bf16.mxu1 %v5214_v15  ;;  %v5260_v13 = vld [vmem:[#allocation10 + $0x228] ss:$16 sps:$4 sm:$0xff]   ;;  %v5265_v15 = vld [vmem:[#allocation10 + $0x244] ss:$16 sps:$4 sm:$0xff]  }
 0x29b   :  { %3792 = vmatpush1.bf16.msra.mxu0 %v5209_v16  ;;  %3874 = vmatpush1.bf16.msra.mxu1 %v5212_v17  ;;  %v5268_v16 = vld [vmem:[#allocation10 + $0x24c] ss:$16 sps:$4 sm:$0xff]   ;;  %v5263_v17 = vld [vmem:[#allocation10 + $0x240] ss:$16 sps:$4 sm:$0xff]  }
 0x29c   :  { %3793 = vmatprep.subr.bf16.mxu0 %v5217_v18  ;;  %3875 = vmatprep.subr.bf16.mxu1 %v5220_v19  ;;  %v5266_v18 = vld [vmem:[#allocation10 + $0x248] ss:$16 sps:$4 sm:$0xff]   ;;  %v5271_v19 = vld [vmem:[#allocation10 + $0x264] ss:$16 sps:$4 sm:$0xff]  }
 0x29f   :  { %3794 = vmatpush1.bf16.msra.mxu0 %v5215_v11  ;;  %3876 = vmatpush1.bf16.msra.mxu1 %v5218_v21  ;;  %v5274_v11 = vld [vmem:[#allocation10 + $0x26c] ss:$16 sps:$4 sm:$0xff]   ;;  %v5269_v21 = vld [vmem:[#allocation10 + $0x260] ss:$16 sps:$4 sm:$0xff]  }
 0x2a0   :  { %3795 = vmatprep.subr.bf16.mxu0 %v5223_v22  ;;  %3877 = vmatprep.subr.bf16.mxu1 %v5226_v23  ;;  %v5272_v22 = vld [vmem:[#allocation10 + $0x268] ss:$16 sps:$4 sm:$0xff]   ;;  %v5277_v23 = vld [vmem:[#allocation10 + $0x284] ss:$16 sps:$4 sm:$0xff]  }
 0x2a3   :  { %3796 = vmatpush1.bf16.msra.mxu0 %v5221_v24  ;;  %3878 = vmatpush1.bf16.msra.mxu1 %v5224_v25  ;;  %v5280_v24 = vld [vmem:[#allocation10 + $0x28c] ss:$16 sps:$4 sm:$0xff]   ;;  %v5275_v25 = vld [vmem:[#allocation10 + $0x280] ss:$16 sps:$4 sm:$0xff]  }
 0x2a4   :  { %3797 = vmatprep.subr.bf16.mxu0 %v5229_v14  ;;  %3879 = vmatprep.subr.bf16.mxu1 %v5232_v26  ;;  %v5278_v14 = vld [vmem:[#allocation10 + $0x288] ss:$16 sps:$4 sm:$0xff]   ;;  %v5283_v26 = vld [vmem:[#allocation10 + $0x2a4] ss:$16 sps:$4 sm:$0xff]  }
 0x2a7   :  { %3798 = vmatpush1.bf16.msra.mxu0 %v5227_v27  ;;  %3880 = vmatpush1.bf16.msra.mxu1 %v5230_v28  ;;  %v5286_v27 = vld [vmem:[#allocation10 + $0x2ac] ss:$16 sps:$4 sm:$0xff]   ;;  %v5281_v28 = vld [vmem:[#allocation10 + $0x2a0] ss:$16 sps:$4 sm:$0xff]  }
 0x2a8   :  { %3799 = vmatprep.subr.bf16.mxu0 %v5235_v29  ;;  %3881 = vmatprep.subr.bf16.mxu1 %v5238_v30  ;;  %v5284_v29 = vld [vmem:[#allocation10 + $0x2a8] ss:$16 sps:$4 sm:$0xff]   ;;  %v5289_v30 = vld [vmem:[#allocation10 + $0x2c4] ss:$16 sps:$4 sm:$0xff]  }
 0x2ab   :  { %3800 = vmatpush1.bf16.msra.mxu0 %v5233_v31  ;;  %3882 = vmatpush1.bf16.msra.mxu1 %v5236_v32  ;;  %v5292_v31 = vld [vmem:[#allocation10 + $0x2cc] ss:$16 sps:$4 sm:$0xff]   ;;  %v5287_v32 = vld [vmem:[#allocation10 + $0x2c0] ss:$16 sps:$4 sm:$0xff]  }
 0x2ac   :  { %3801 = vmatprep.subr.bf16.mxu0 %v5241_v33  ;;  %3883 = vmatprep.subr.bf16.mxu1 %v5244_v34  ;;  %v5290_v33 = vld [vmem:[#allocation10 + $0x2c8] ss:$16 sps:$4 sm:$0xff]   ;;  %v5295_v34 = vld [vmem:[#allocation10 + $0x2e4] ss:$16 sps:$4 sm:$0xff]  }
 0x2af   :  { %3802 = vmatpush1.bf16.msra.mxu0 %v5239_v35  ;;  %3884 = vmatpush1.bf16.msra.mxu1 %v5242_v36  ;;  %v5298_v35 = vld [vmem:[#allocation10 + $0x2ec] ss:$16 sps:$4 sm:$0xff]   ;;  %v5293_v36 = vld [vmem:[#allocation10 + $0x2e0] ss:$16 sps:$4 sm:$0xff]  }
 0x2b0   :  { %3803 = vmatprep.subr.bf16.mxu0 %v5247_v37  ;;  %3885 = vmatprep.subr.bf16.mxu1 %v5250_v38  ;;  %v5296_v37 = vld [vmem:[#allocation10 + $0x2e8] ss:$16 sps:$4 sm:$0xff]   ;;  %v5301_v38 = vld [vmem:[#allocation10 + $0x304] ss:$16 sps:$4 sm:$0xff]  }
 0x2b3   :  { %3804 = vmatpush1.bf16.msra.mxu0 %v5245_v39  ;;  %3886 = vmatpush1.bf16.msra.mxu1 %v5248_v40  ;;  %v5304_v39 = vld [vmem:[#allocation10 + $0x30c] ss:$16 sps:$4 sm:$0xff]   ;;  %v5299_v40 = vld [vmem:[#allocation10 + $0x300] ss:$16 sps:$4 sm:$0xff]  }
 0x2b4   :  { %3814 = vmatprep.subr.bf16.mxu0 %v5253_v41  ;;  %3896 = vmatprep.subr.bf16.mxu1 %v5256_v20  ;;  %v5302_v41 = vld [vmem:[#allocation10 + $0x308] ss:$16 sps:$4 sm:$0xff]   ;;  %v5307_v20 = vld [vmem:[#allocation10 + $0x324] ss:$16 sps:$4 sm:$0xff]  }
 0x349   :  { %v2878_v51 = vpop.f32.mrb[4].mxu0  ;;  %v5632_v52 = vpop.f32.mrb[4].mxu1 }
 0x34a   :  { %v4516_v53 = vadd.f32 %v2878_v51, %v2146_v48  ;;  %v2880_v54 = vpop.f32.mrb[5].mxu0  ;;  %v2962_v55 = vpop.f32.mrb[5].mxu1  ;;  %v5305_v48 = vld [vmem:[#allocation10 + $0x320] ss:$16 sps:$4 sm:$0xff]   ;;  %v5316_v51 = vld [vmem:[#allocation10 + $0x34c] ss:$16 sps:$4 sm:$0xff]  }
 0x34b   :  { %v4517_v56 = vadd.f32 %v2880_v54, %v2150_v49  ;;  %v4519_v57 = vadd.f32 %v2962_v55, %v2158_v50  ;;  %v2882_v58 = vpop.f32.mrb[6].mxu0  ;;  %v2964_v59 = vpop.f32.mrb[6].mxu1  ;;  %v5308_v49 = vld [vmem:[#allocation10 + $0x328] ss:$16 sps:$4 sm:$0xff]   ;;  %v5313_v50 = vld [vmem:[#allocation10 + $0x344] ss:$16 sps:$4 sm:$0xff]  }
 0x34c   :  { %vm2967_vm4 = vcmp.gt.f32.partialorder %v4516_v53, 0.0  ;;  %v2971_v60 = vmul.f32 0.2, %v4516_v53  ;;  %v2883_v0 = vpop.f32.mrb[7].mxu0  ;;  %v2965_v1 = vpop.f32.mrb[7].mxu1 }
 0x34d   :  { %vm2968_vm5 = vcmp.gt.f32.partialorder %v4517_v56, 0.0  ;;  %v2972_v61 = vmul.f32 0.2, %v4517_v56  ;;  %vm2970_vm6 = vcmp.gt.f32.partialorder %v4519_v57, 0.0  ;;  %v2974_v62 = vmul.f32 0.2, %v4519_v57 }
 0x34e   :  { %v2975_v63 = vsel %vm2967_vm4, %v4516_v53, %v2971_v60  ;;  %v5311_v53 = vld [vmem:[#allocation10 + $0x340] ss:$16 sps:$4 sm:$0xff]   ;;  %v5314_v54 = vld [vmem:[#allocation10 + $0x348] ss:$16 sps:$4 sm:$0xff]   ;;  %v5319_v55 = vld [vmem:[#allocation10 + $0x364] ss:$16 sps:$4 sm:$0xff]  }
 0x34f   :  { %v2976_v2 = vsel %vm2968_vm5, %v4517_v56, %v2972_v61  ;;  %v2978_v6 = vsel %vm2970_vm6, %v4519_v57, %v2974_v62  ;;  %v2979_v7 = vpack.c.bf16 %v2975_v63, %v2975_v63  ;;  %v5322_v56 = vld [vmem:[#allocation10 + $0x36c] ss:$16 sps:$4 sm:$0xff]   ;;  %v5317_v57 = vld [vmem:[#allocation10 + $0x360] ss:$16 sps:$4 sm:$0xff]   ;;  %v5320_v58 = vld [vmem:[#allocation10 + $0x368] ss:$16 sps:$4 sm:$0xff]  }
 0x350   :  { %v2980_v3 = vpack.c.bf16 %v2976_v2, %v2976_v2  ;;  %v2982_v10 = vpack.c.bf16 %v2978_v6, %v2978_v6  ;;  %v5325_v59 = vld [vmem:[#allocation10 + $0x384] ss:$16 sps:$4 sm:$0xff]   ;;  %v5328_v60 = vld [vmem:[#allocation10 + $0x38c] ss:$16 sps:$4 sm:$0xff]   ;;  %v5635_v61 = vsub.s32 2, %v5610_v43 }
 0x351   :  { %v5323_v62 = vld [vmem:[#allocation10 + $0x380] ss:$16 sps:$4 sm:$0xff]   ;;  %v5326_v63 = vld [vmem:[#allocation10 + $0x388] ss:$16 sps:$4 sm:$0xff]   ;;  %v5331_v0 = vld [vmem:[#allocation10 + $0x3a4] ss:$16 sps:$4 sm:$0xff]  }
 0x352   :  { %3805 = vmatprep.mubr.bf16.mxu0 %v2980_v3  ;;  %3887 = vmatprep.mubr.bf16.mxu1 %v2980_v3  ;;  %v5334_v1 = vld [vmem:[#allocation10 + $0x3ac] ss:$16 sps:$4 sm:$0xff]   ;;  %v2154_v2 = vrot.slane %v5618_v45, %v5635_v61  ;;  %v5329_v3 = vld [vmem:[#allocation10 + $0x3a0] ss:$16 sps:$4 sm:$0xff]  }
 0x353   :  { %3806 = vmatmul.mubr.bf16.vlgmr.msra.gmra.mrb[8].mxu0 %v2979_v7  ;;  %3888 = vmatmul.mubr.bf16.vlgmr.msra.gmra.mrb[8].mxu1 %v2979_v7  ;;  %v5340_v43 = vld [vmem:[#allocation10 + $0x3cc] ss:$16 sps:$4 sm:$0xff]   ;;  %v5335_v7 = vld [vmem:[#allocation10 + $0x3c0] ss:$16 sps:$4 sm:$0xff]  }
 0x354   :  { %3815 = vmatpush1.bf16.msra.mxu0 %v5251_v4  ;;  %3897 = vmatpush1.bf16.msra.mxu1 %v5254_v5  ;;  %v5332_v4 = vld [vmem:[#allocation10 + $0x3a8] ss:$16 sps:$4 sm:$0xff]   ;;  %v5337_v5 = vld [vmem:[#allocation10 + $0x3c4] ss:$16 sps:$4 sm:$0xff]   ;;  %v4518_v6 = vadd.f32 %v5632_v52, %v2154_v2  ;;  %v5341_v45 = vld [vmem:[#allocation10 + $0x3e0] ss:$16 sps:$4 sm:$0xff]  }
 0x355   :  { %3846 = vmatprep.mubr.bf16.mxu0 %v2982_v10  ;;  %3928 = vmatprep.mubr.bf16.mxu1 %v2982_v10  ;;  %v5346_v10 = vld [vmem:[#allocation10 + $0x3ec] ss:$16 sps:$4 sm:$0xff]  }
 0x356   :  { %3816 = vmatprep.subr.bf16.mxu0 %v5259_v8  ;;  %3898 = vmatprep.subr.bf16.mxu1 %v5262_v9  ;;  %v5338_v8 = vld [vmem:[#allocation10 + $0x3c8] ss:$16 sps:$4 sm:$0xff]   ;;  %v5343_v9 = vld [vmem:[#allocation10 + $0x3e4] ss:$16 sps:$4 sm:$0xff]   ;;  %vm2969_vm7 = vcmp.gt.f32.partialorder %v4518_v6, 0.0 }
 0x358   :  { %3817 = vmatpush1.bf16.msra.mxu0 %v5257_v12  ;;  %3899 = vmatpush1.bf16.msra.mxu1 %v5260_v13  ;;  %v2973_v12 = vmul.f32 0.2, %v4518_v6  ;;  %v5344_v13 = vld [vmem:[#allocation10 + $0x3e8] ss:$16 sps:$4 sm:$0xff]  }
 0x359   :  { %3818 = vmatprep.subr.bf16.mxu0 %v5265_v15  ;;  %3900 = vmatprep.subr.bf16.mxu1 %v5268_v16  ;;  %v3111_v16 = vld [vmem:[%s5666_s6] sm:$0xf] }
 0x35a   :  { %v2977_v15 = vsel %vm2969_vm7, %v4518_v6, %v2973_v12 }
 0x35b   :  { %v2981_v52 = vpack.c.bf16 %v2977_v15, %v2977_v15 }
 0x35c   :  { %3819 = vmatpush1.bf16.msra.mxu0 %v5263_v17  ;;  %3901 = vmatpush1.bf16.msra.mxu1 %v5266_v18  ;;  %v3116_v17 = vrot.slane %v3111_v16, %v5613_v44  ;;  %v3124_v18 = vrot.slane %v3111_v16, %v5635_v61 }
 0x35d   :  { %3820 = vmatprep.subr.bf16.mxu0 %v5271_v19  ;;  %3902 = vmatprep.subr.bf16.mxu1 %v5274_v11  ;;  %v3120_v19 = vrot.slane %v3111_v16, %v5621_v46  ;;  %v3128_v11 = vrot.slane %v3111_v16, %v5624_v47 }
 0x360   :  { %3821 = vmatpush1.bf16.msra.mxu0 %v5269_v21  ;;  %3903 = vmatpush1.bf16.msra.mxu1 %v5272_v22  ;;  %v3949_v21 = vld [vmem:[%s5667_s7] sm:$0xf] }
 0x361   :  { %3822 = vmatprep.subr.bf16.mxu0 %v5277_v23  ;;  %3904 = vmatprep.subr.bf16.mxu1 %v5280_v24 }
 0x364   :  { %3823 = vmatpush1.bf16.msra.mxu0 %v5275_v25  ;;  %3905 = vmatpush1.bf16.msra.mxu1 %v5278_v14 }
 0x365   :  { %3824 = vmatprep.subr.bf16.mxu0 %v5283_v26  ;;  %3906 = vmatprep.subr.bf16.mxu1 %v5286_v27 }
 0x368   :  { %3825 = vmatpush1.bf16.msra.mxu0 %v5281_v28  ;;  %3907 = vmatpush1.bf16.msra.mxu1 %v5284_v29 }
 0x369   :  { %3826 = vmatprep.subr.bf16.mxu0 %v5289_v30  ;;  %3908 = vmatprep.subr.bf16.mxu1 %v5292_v31  ;;  %v3954_v31 = vrot.slane %v3949_v21, %v5613_v44  ;;  %v3966_v44 = vrot.slane %v3949_v21, %v5624_v47 }
 0x36c   :  { %3827 = vmatpush1.bf16.msra.mxu0 %v5287_v32  ;;  %3909 = vmatpush1.bf16.msra.mxu1 %v5290_v33  ;;  %v3958_v32 = vrot.slane %v3949_v21, %v5621_v46 }
 0x36d   :  { %3828 = vmatprep.subr.bf16.mxu0 %v5295_v34  ;;  %3910 = vmatprep.subr.bf16.mxu1 %v5298_v35 }
 0x370   :  { %3829 = vmatpush1.bf16.msra.mxu0 %v5293_v36  ;;  %3911 = vmatpush1.bf16.msra.mxu1 %v5296_v37 }
 0x371   :  { %3830 = vmatprep.subr.bf16.mxu0 %v5301_v38  ;;  %3912 = vmatprep.subr.bf16.mxu1 %v5304_v39 }
 0x374   :  { %3831 = vmatpush1.bf16.msra.mxu0 %v5299_v40  ;;  %3913 = vmatpush1.bf16.msra.mxu1 %v5302_v41  ;;  %v3962_v40 = vrot.slane %v3949_v21, %v5635_v61 }
 0x375   :  { %3832 = vmatprep.subr.bf16.mxu0 %v5307_v20  ;;  %3914 = vmatprep.subr.bf16.mxu1 %v5310_v42 }
 0x378   :  { %3833 = vmatpush1.bf16.msra.mxu0 %v5305_v48  ;;  %3915 = vmatpush1.bf16.msra.mxu1 %v5308_v49 }
 0x379   :  { %3834 = vmatprep.subr.bf16.mxu0 %v5313_v50  ;;  %3916 = vmatprep.subr.bf16.mxu1 %v5316_v51 }
 0x37c   :  { %3835 = vmatpush1.bf16.msra.mxu0 %v5311_v53  ;;  %3917 = vmatpush1.bf16.msra.mxu1 %v5314_v54 }
 0x37d   :  { %3836 = vmatprep.subr.bf16.mxu0 %v5319_v55  ;;  %3918 = vmatprep.subr.bf16.mxu1 %v5322_v56  ;;  %v3981_v55 = vstv %s5668_s8 }
 0x380   :  { %3837 = vmatpush1.bf16.msra.mxu0 %v5317_v57  ;;  %3919 = vmatpush1.bf16.msra.mxu1 %v5320_v58 }
 0x381   :  { %3838 = vmatprep.subr.bf16.mxu0 %v5325_v59  ;;  %3920 = vmatprep.subr.bf16.mxu1 %v5328_v60 }
 0x384   :  { %3839 = vmatpush1.bf16.msra.mxu0 %v5323_v62  ;;  %3921 = vmatpush1.bf16.msra.mxu1 %v5326_v63 }
 0x385   :  { %3840 = vmatprep.subr.bf16.mxu0 %v5331_v0  ;;  %3922 = vmatprep.subr.bf16.mxu1 %v5334_v1 }
 0x388   :  { %3841 = vmatpush1.bf16.msra.mxu0 %v5329_v3  ;;  %3923 = vmatpush1.bf16.msra.mxu1 %v5332_v4 }
 0x389   :  { %3842 = vmatprep.subr.bf16.mxu0 %v5337_v5  ;;  %3924 = vmatprep.subr.bf16.mxu1 %v5340_v43 }
 0x38c   :  { %3843 = vmatpush1.bf16.msra.mxu0 %v5335_v7  ;;  %3925 = vmatpush1.bf16.msra.mxu1 %v5338_v8 }
 0x38d   :  { %3844 = vmatprep.subr.bf16.mxu0 %v5343_v9  ;;  %3926 = vmatprep.subr.bf16.mxu1 %v5346_v10 }
 0x390   :  { %3845 = vmatpush1.bf16.msra.mxu0 %v5341_v45  ;;  %3927 = vmatpush1.bf16.msra.mxu1 %v5344_v13 }
 0x393   :  { %3847 = vmatmul.mubr.bf16.vlgmr.msra.gmra.mrb[8].mxu0 %v2981_v52  ;;  %3929 = vmatmul.mubr.bf16.vlgmr.msra.gmra.mrb[8].mxu1 %v2981_v52 }
 0x466   :  { %v3848_v22 = vpop.f32.mrb[8].mxu0  ;;  %v3930_v23 = vpop.f32.mrb[8].mxu1 }
 0x467   :  { %v4520_v24 = vadd.f32 %v3848_v22, %v3116_v17  ;;  %v4522_v25 = vadd.f32 %v3930_v23, %v3124_v18  ;;  %v3850_v14 = vpop.f32.mrb[9].mxu0  ;;  %v3932_v26 = vpop.f32.mrb[9].mxu1 }
 0x468   :  { %v4521_v27 = vadd.f32 %v3850_v14, %v3120_v19  ;;  %v4523_v28 = vadd.f32 %v3932_v26, %v3128_v11  ;;  %v3852_v29 = vpop.f32.mrb[10].mxu0  ;;  %v3934_v30 = vpop.f32.mrb[10].mxu1 }
 0x469   :  { %vm3937_vm8 = vcmp.gt.f32.partialorder %v4520_v24, 0.0  ;;  %v3941_v33 = vmul.f32 0.2, %v4520_v24  ;;  %vm3939_vm9 = vcmp.gt.f32.partialorder %v4522_v25, 0.0  ;;  %v3943_v34 = vmul.f32 0.2, %v4522_v25 }
 0x46a   :  { %vm3938_vm10 = vcmp.gt.f32.partialorder %v4521_v27, 0.0  ;;  %v3942_v35 = vmul.f32 0.2, %v4521_v27  ;;  %v3944_v36 = vmul.f32 0.2, %v4523_v28  ;;  %vm3940_vm11 = vcmp.gt.f32.partialorder %v4523_v28, 0.0 }
 0x46b   :  { %v3945_v37 = vsel %vm3937_vm8, %v4520_v24, %v3941_v33  ;;  %v3853_v38 = vpop.f32.mrb[11].mxu0  ;;  %v3935_v39 = vpop.f32.mrb[11].mxu1  ;;  %v3947_v20 = vsel %vm3939_vm9, %v4522_v25, %v3943_v34 }
 0x46c   :  { %v3946_v41 = vsel %vm3938_vm10, %v4521_v27, %v3942_v35  ;;  %v3971_v42 = vmul.f32 %v3954_v31, %v3945_v37  ;;  %v3948_v46 = vsel %vm3940_vm11, %v4523_v28, %v3944_v36  ;;  %v3973_v49 = vmul.f32 %v3962_v40, %v3947_v20 }
 0x46d   :  { %v3972_v48 = vmul.f32 %v3958_v32, %v3946_v41  ;;  %v3974_v51 = vmul.f32 %v3966_v44, %v3948_v46 }
 0x46f   :  { %v3975_v50 = vadd.f32 %v3972_v48, %v3971_v42 }
 0x471   :  { %v3976_v53 = vadd.f32 %v3975_v50, %v3973_v49 }
 0x473   :  { %v3977_v54 = vadd.f32 %v3976_v53, %v3974_v51 }
 0x475   :  { %3978 = vadd.xlane.f32.xlu0 %v3977_v54 }
 0x502   :  { %v3979_v56 = vpop.xlane.xlu0 %3978 }
 0x503   :  { %v3982_v57 = vadd.f32 %v3981_v55, %v3979_v56 }
 0x505   :  { %3984 = vst.msk [vmem:[%s5669_s9] sm:$0xff] %vm3983_vm12, %v3982_v57 }
 0x506   :  { %3989 = vsyncpa [#allocation4], 1 }
 0x507   :  { %3990 = vsyncpa [#allocation6], 1 }
 0x508   :  { %3991 = vsyncpa [#allocation9], 1 }

</bundles_post_ra>
